<compile_context>
chip_gen: v6e
topology: v6e:2x2x1
jax: 0.10.0
libtpu: 0.0.40
codegen_flags: <defaults>
</compile_context>

<pallas_src>
import functools

import numpy as np
import jax
import jax.numpy as jnp
from jax.experimental import pallas as pl
from jax.experimental.pallas import tpu as pltpu


def _lesion_triplet_kernel(counts_ref, f_ref, ft_ref, lab_row_ref, m_row_ref,
                           m_col_ref, c01_ref, out_ref, *, inv_d, exp_dtype):
    dims = (((1,), (0,)), ((), ()))  # contract last of LHS with first of RHS

    # (TM, D) bf16 anchor strip x (D, N) bf16 resident (f/t)^T -> f32 Gram
    # strip on the MXU.  1/t is pre-folded into the RHS in the wrapper, so no
    # per-element scale of the (TM, N) slab is needed here.
    g = jax.lax.dot_general(f_ref[...], ft_ref[...], dims,
                            preferred_element_type=jnp.float32)        # (TM, N)

    lab_row = lab_row_ref[...]     # (TM, 1) f32 anchor labels
    m_row = m_row_ref[...]         # (TM, 1) 1.0 iff anchor row is non-zero

    # Row max over *unmasked* columns is safe: padded / all-zero columns give
    # g == 0, and every surviving anchor sees its own diagonal g_ii >= 0, so
    # the unmasked max equals the masked max for every row kept by m_row.
    row_max = jnp.max(g, axis=1, keepdims=True)                        # (TM, 1)
    e = jnp.exp((g - row_max).astype(exp_dtype))                       # (TM, N)

    # Column non-zero filter applied multiplicatively AFTER exp via an MXU
    # mat-vec (no -inf sentinel, bf16-exp safe).
    exp_sum = jax.lax.dot_general(e, m_col_ref[...], dims,
                                  preferred_element_type=jnp.float32)  # (TM, 1)
    exp_sum = jnp.maximum(exp_sum, jnp.float32(1e-30))
    lse = row_max + jnp.log(exp_sum)                                   # (TM, 1)

    # Same-class pair logit sums: one width-2 matvec against the precomputed
    # (already non-zero-filtered) [label==0, label==1] columns, then a per-row
    # select -- no (TM, N) mask slab and no cnt matvec.
    s = jax.lax.dot_general(g, c01_ref[...].astype(jnp.float32), dims,
                            preferred_element_type=jnp.float32)        # (TM, 2)
    is_zero_class = lab_row == 0.0
    sum_logits = jnp.where(is_zero_class, s[:, 0:1], s[:, 1:2])        # (TM, 1)
    cnt = jnp.where(is_zero_class, counts_ref[0],
                    counts_ref[1]).astype(jnp.float32)                 # (TM, 1)

    # torch: sum_j log(exp(g_ij)/deno_i) / (-p_num), with p_num == lesion_dim.
    out_ref[...] = (cnt * lse - sum_logits) * inv_d * m_row


def lesion_triplet_loss(feats, labels, tem, *, tm=None, exp_dtype=None):
    """feats: (b, lesion_num, lesion_dim) f32, labels: (b, lesion_num) in {0,1}."""
    b, lesion_num, lesion_dim = feats.shape
    n = b * lesion_num
    d = lesion_dim

    # ---- per-chip knobs (robust fallbacks keep this portable) --------------
    try:
        vmem_cap = int(pltpu.get_tpu_info().vmem_capacity_bytes)
    except Exception:
        vmem_cap = 64 * 1024 * 1024          # conservative: v7x per-TC VMEM
    try:
        kind = jax.devices()[0].device_kind.lower()
    except Exception:
        kind = ""
    if exp_dtype is None:
        # bf16 EUP/VPU path exists on v6e/v7x; keep f32 on v5e / unknown chips.
        exp_dtype = jnp.bfloat16 if ("v6" in kind or "v7" in kind) else jnp.float32
    esize = jnp.dtype(exp_dtype).itemsize

    # ---- padding / tile selection ------------------------------------------
    n_pad = max(128, -(-n // 128) * 128)      # lane-dense column count
    if tm is None:
        # 512 only on 128 MiB-VMEM parts (v5e/v6e) with enough rows; 256 default.
        tm = 512 if (vmem_cap > 96 * 1024 * 1024 and n_pad >= 2048) else 256
    tm = max(128, (int(tm) // 128) * 128)
    tm = min(tm, n_pad)

    vmem_budget = vmem_cap * 3 // 4           # never request the whole VMEM

    def est(tm_):
        np_ = -(-n_pad // tm_) * tm_
        slab = tm_ * np_
        return (slab * (4 + esize)            # live g (f32) + e (exp_dtype) slabs
                + slab * 4                    # headroom for one f32 temporary
                + 2 * tm_ * d * 2             # anchor strip, double-buffered bf16
                + d * np_ * 2                 # resident f^T, single-buffered bf16
                + 2 * np_ * 512               # (N,1)/(N,2) columns, tile-padded
                + 6 * tm_ * 512               # lab/m_row/out (tm,1) buffers
                + (2 << 20))                  # slack

    while tm > 128 and est(tm) > vmem_budget:
        tm = max(128, tm // 2)
    n_pad = -(-n_pad // tm) * tm
    # Give a two-TensorCore part (v7x) at least 2 grid steps when possible.
    if n_pad // tm < 2 and n_pad >= 256 and (n_pad // 2) % 128 == 0:
        tm = n_pad // 2
    num_tiles = n_pad // tm
    vmem_limit = int(min(max(est(tm), 16 * 1024 * 1024), vmem_budget))
    pad = n_pad - n

    # ---- wrapper-side data prep ---------------------------------------------
    f = feats.reshape(n, d).astype(jnp.float32)
    lab = labels.reshape(n).astype(jnp.float32)
    nz = jnp.any(f != 0.0, axis=1).astype(jnp.float32)   # non_zero_rows mask
    if pad:
        f = jnp.pad(f, ((0, pad), (0, 0)))
        lab = jnp.pad(lab, (0, pad))
        nz = jnp.pad(nz, (0, pad))

    inv_t = 1.0 / float(tem)
    f_bf = f.astype(jnp.bfloat16)                              # MXU LHS (anchors)
    ft_bf = jnp.transpose((f * inv_t).astype(jnp.bfloat16))    # (D, N) pre-scaled RHS

    c0 = (lab == 0.0).astype(jnp.float32) * nz
    c1 = (lab == 1.0).astype(jnp.float32) * nz
    c01 = jnp.stack([c0, c1], axis=1).astype(jnp.bfloat16)     # (N, 2), exact 0/1
    counts = jnp.stack([jnp.sum(c0), jnp.sum(c1)]).astype(jnp.int32)  # SMEM scalars

    lab_row = lab.reshape(n_pad, 1)
    m_row = nz.reshape(n_pad, 1)
    m_col = nz.reshape(n_pad, 1).astype(exp_dtype)

    kernel = functools.partial(_lesion_triplet_kernel,
                               inv_d=1.0 / float(lesion_dim),
                               exp_dtype=exp_dtype)

    def make_call(const_mode):
        def cspec(shape):
            if const_mode is None:
                return pl.BlockSpec(shape, lambda i, c: (0, 0))
            return pl.BlockSpec(shape, lambda i, c: (0, 0), pipeline_mode=const_mode)

        grid_spec = pltpu.PrefetchScalarGridSpec(
            num_scalar_prefetch=1,
            grid=(num_tiles,),
            in_specs=[
                pl.BlockSpec((tm, d), lambda i, c: (i, 0)),   # anchor strip (bf16)
                cspec((d, n_pad)),                            # resident (f/t)^T (bf16)
                pl.BlockSpec((tm, 1), lambda i, c: (i, 0)),   # labels, row orientation
                pl.BlockSpec((tm, 1), lambda i, c: (i, 0)),   # non-zero mask, rows
                cspec((n_pad, 1)),                            # non-zero mask, matvec RHS
                cspec((n_pad, 2)),                            # [label==0, label==1] columns
            ],
            out_specs=pl.BlockSpec((tm, 1), lambda i, c: (i, 0)),
        )
        return pl.pallas_call(
            kernel,
            out_shape=jax.ShapeDtypeStruct((n_pad, 1), jnp.float32),
            grid_spec=grid_spec,
            compiler_params=pltpu.CompilerParams(
                dimension_semantics=("parallel",),
                vmem_limit_bytes=vmem_limit),
        )

    args = (counts, f_bf, ft_bf, lab_row, m_row, m_col, c01)
    try:
        # Constant-index inputs fetched once -> single-buffer them (pure VMEM
        # headroom, most valuable on v7x).
        per_anchor = make_call(pl.Buffered(1))(*args)
    except Exception:
        # This jax build rejects single-buffering; default double-buffering.
        per_anchor = make_call(None)(*args)

    return jnp.sum(per_anchor) / float(b)


def _reference_loss(feats, labels, tem):
    """Direct numpy transcription of the PyTorch forward (for verification)."""
    feats = np.asarray(feats, dtype=np.float64)
    labels = np.asarray(labels)
    b, L, D = feats.shape
    f = feats.reshape(b * L, D)
    lab = labels.reshape(b * L)
    nz = np.any(f != 0, axis=1)
    fn, ln = f[nz], lab[nz]
    pos, neg = fn[ln == 1], fn[ln == 0]
    loss = 0.0
    for i in range(fn.shape[0]):
        anchor = fn[i:i + 1]
        deno_exp_sum = np.exp(anchor @ fn.T / tem).sum()
        pp = neg if ln[i] == 0 else pos
        p_num = pp.shape[1]
        num = anchor @ pp.T / tem
        loss += np.log(np.exp(num) / deno_exp_sum).sum() / (-p_num)
    return loss / b


if __name__ == "__main__":
    b, lesion_num, lesion_dim = 2, 8, 32
    tem = 0.5

    key = jax.random.PRNGKey(0)
    kf, kl = jax.random.split(key)
    feats = jax.random.normal(kf, (b, lesion_num, lesion_dim), dtype=jnp.float32)
    labels = jax.random.randint(kl, (b, lesion_num), 0, 2, dtype=jnp.int32)
    # Zero out a few lesion slots so the non-zero-row filter is exercised.
    feats = feats.at[0, 3, :].set(0.0)
    feats = feats.at[1, 6, :].set(0.0)

    # Validation run in f32 exp (bf16-exp is the training-speed default on v6e/v7x).
    out = jax.block_until_ready(
        lesion_triplet_loss(feats, labels, tem, exp_dtype=jnp.float32))

    # Reference in float64; feats are quantized through bf16 first so the check
    # isolates semantics from the intentional bf16 MXU-input cast in the kernel
    # (tem=0.5 is a power of two, so the pre-scaled RHS quantizes identically).
    feats_bf = np.asarray(feats.astype(jnp.bfloat16).astype(jnp.float32))
    ref = _reference_loss(feats_bf, np.asarray(labels), tem)
    np.testing.assert_allclose(float(out), float(ref), rtol=1e-3, atol=1e-4)

    # Also exercise the per-chip auto defaults (bf16 exp on v6e/v7x) once.
    out_auto = jax.block_until_ready(lesion_triplet_loss(feats, labels, tem))
    np.testing.assert_allclose(float(out_auto), float(ref), rtol=5e-2, atol=1e-3)

    print("KERNEL_OK")
</pallas_src>

<mosaic_0001>
module attributes {stable_mosaic.version = 11 : i64} {
  func.func @_lesion_triplet_kernel(%arg0: i32, %arg1: memref<2xi32, #tpu.memory_space<smem>>, %arg2: memref<128x32xbf16, #tpu.memory_space<vmem>>, %arg3: memref<32x128xbf16, #tpu.memory_space<vmem>>, %arg4: memref<128x1xf32, #tpu.memory_space<vmem>>, %arg5: memref<128x1xf32, #tpu.memory_space<vmem>>, %arg6: memref<128x1xf32, #tpu.memory_space<vmem>>, %arg7: memref<128x2xbf16, #tpu.memory_space<vmem>>, %arg8: memref<128x1xf32, #tpu.memory_space<vmem>>) attributes {dimension_semantics = [#tpu.dimension_semantics<parallel>], iteration_bounds = array<i64: 1>, scalar_prefetch = 1 : i64, scratch_operands = 0 : i64, tpu.core_type = #tpu.core_type<tc>, window_params = [{transform_indices = @transform_0, window_bounds = array<i64: 128, 32>}, {pipeline_mode = #tpu.pipeline_mode<synchronous>, transform_indices = @transform_1, window_bounds = array<i64: 32, 128>}, {transform_indices = @transform_2, window_bounds = array<i64: 128, 1>}, {transform_indices = @transform_3, window_bounds = array<i64: 128, 1>}, {pipeline_mode = #tpu.pipeline_mode<synchronous>, transform_indices = @transform_4, window_bounds = array<i64: 128, 1>}, {pipeline_mode = #tpu.pipeline_mode<synchronous>, transform_indices = @transform_5, window_bounds = array<i64: 128, 2>}, {transform_indices = @transform_6, window_bounds = array<i64: 128, 1>}]} {
    %c0 = arith.constant 0 : index
    %c0_0 = arith.constant 0 : index
    %0 = vector.load %arg2[%c0, %c0_0] : memref<128x32xbf16, #tpu.memory_space<vmem>>, vector<128x32xbf16>
    %c0_1 = arith.constant 0 : index
    %c0_2 = arith.constant 0 : index
    %1 = vector.load %arg3[%c0_1, %c0_2] : memref<32x128xbf16, #tpu.memory_space<vmem>>, vector<32x128xbf16>
    %cst = arith.constant dense<0.000000e+00> : vector<128x128xf32>
    %2 = tpu.matmul %0, %1, %cst {dimension_numbers = #tpu.dot_dimension_numbers<[1], [0], [0], [1], [0, 0, 1, 1], [], []>} : vector<128x32xbf16>, vector<32x128xbf16>, vector<128x128xf32> -> vector<128x128xf32>
    %c0_3 = arith.constant 0 : index
    %c0_4 = arith.constant 0 : index
    %3 = vector.load %arg4[%c0_3, %c0_4] : memref<128x1xf32, #tpu.memory_space<vmem>>, vector<128x1xf32>
    %c0_5 = arith.constant 0 : index
    %c0_6 = arith.constant 0 : index
    %4 = vector.load %arg5[%c0_5, %c0_6] : memref<128x1xf32, #tpu.memory_space<vmem>>, vector<128x1xf32>
    %cst_7 = arith.constant dense<0xFF800000> : vector<128xf32>
    %5 = vector.multi_reduction <maximumf>, %2, %cst_7 [1] : vector<128x128xf32> to vector<128xf32>
    %6 = vector.shape_cast %5 : vector<128xf32> to vector<128x1xf32>
    %7 = vector.broadcast %6 : vector<128x1xf32> to vector<128x128xf32>
    %8 = arith.subf %2, %7 : vector<128x128xf32>
    %9 = math.exp %8 : vector<128x128xf32>
    %c0_8 = arith.constant 0 : index
    %c0_9 = arith.constant 0 : index
    %10 = vector.load %arg6[%c0_8, %c0_9] : memref<128x1xf32, #tpu.memory_space<vmem>>, vector<128x1xf32>
    %cst_10 = arith.constant dense<0.000000e+00> : vector<128x1xf32>
    %11 = tpu.matmul %9, %10, %cst_10 {dimension_numbers = #tpu.dot_dimension_numbers<[1], [0], [0], [1], [0, 0, 1, 1], [], []>} : vector<128x128xf32>, vector<128x1xf32>, vector<128x1xf32> -> vector<128x1xf32>
    %cst_11 = arith.constant 1.000000e-30 : f32
    %12 = vector.broadcast %cst_11 : f32 to vector<128x1xf32>
    %13 = arith.maximumf %11, %12 : vector<128x1xf32>
    %14 = math.log %13 : vector<128x1xf32>
    %15 = arith.addf %6, %14 : vector<128x1xf32>
    %c0_12 = arith.constant 0 : index
    %c0_13 = arith.constant 0 : index
    %16 = vector.load %arg7[%c0_12, %c0_13] : memref<128x2xbf16, #tpu.memory_space<vmem>>, vector<128x2xbf16>
    %17 = arith.extf %16 : vector<128x2xbf16> to vector<128x2xf32>
    %cst_14 = arith.constant dense<0.000000e+00> : vector<128x2xf32>
    %18 = tpu.matmul %2, %17, %cst_14 {dimension_numbers = #tpu.dot_dimension_numbers<[1], [0], [0], [1], [0, 0, 1, 1], [], []>} : vector<128x128xf32>, vector<128x2xf32>, vector<128x2xf32> -> vector<128x2xf32>
    %cst_15 = arith.constant 0.000000e+00 : f32
    %19 = vector.broadcast %cst_15 : f32 to vector<128x1xf32>
    %20 = arith.cmpf oeq, %3, %19 : vector<128x1xf32>
    %21 = vector.extract_strided_slice %18 {offsets = [0, 0], sizes = [128, 1], strides = [1, 1]} : vector<128x2xf32> to vector<128x1xf32>
    %22 = vector.extract_strided_slice %18 {offsets = [0, 1], sizes = [128, 1], strides = [1, 1]} : vector<128x2xf32> to vector<128x1xf32>
    %23 = arith.select %20, %21, %22 : vector<128x1xi1>, vector<128x1xf32>
    %c0_16 = arith.constant 0 : index
    %24 = memref.load %arg1[%c0_16] : memref<2xi32, #tpu.memory_space<smem>>
    %c1 = arith.constant 1 : index
    %25 = memref.load %arg1[%c1] : memref<2xi32, #tpu.memory_space<smem>>
    %26 = vector.broadcast %24 : i32 to vector<128x1xi32>
    %27 = vector.broadcast %25 : i32 to vector<128x1xi32>
    %28 = arith.select %20, %26, %27 : vector<128x1xi1>, vector<128x1xi32>
    %29 = arith.sitofp %28 : vector<128x1xi32> to vector<128x1xf32>
    %30 = arith.mulf %29, %15 : vector<128x1xf32>
    %31 = arith.subf %30, %23 : vector<128x1xf32>
    %cst_17 = arith.constant 3.125000e-02 : f32
    %32 = vector.broadcast %cst_17 : f32 to vector<128x1xf32>
    %33 = arith.mulf %31, %32 : vector<128x1xf32>
    %34 = arith.mulf %33, %4 : vector<128x1xf32>
    %c0_18 = arith.constant 0 : index
    %c0_19 = arith.constant 0 : index
    %35 = vector.load %arg8[%c0_18, %c0_19] : memref<128x1xf32, #tpu.memory_space<vmem>>, vector<128x1xf32>
    tpu.vector_store %arg8[%c0_18, %c0_19], %34 {strides = array<i32>} : memref<128x1xf32, #tpu.memory_space<vmem>>, vector<128x1xf32>,
    return
  }
  func.func @transform_0(%arg0: i32, %arg1: memref<2xi32, #tpu.memory_space<smem>>) -> (i32, i32) {
    %c0_i32 = arith.constant 0 : i32
    %c0_i32_0 = arith.constant 0 : i32
    return %arg0, %c0_i32 : i32, i32
  }
  func.func @transform_1(%arg0: i32, %arg1: memref<2xi32, #tpu.memory_space<smem>>) -> (i32, i32) {
    %c0_i32 = arith.constant 0 : i32
    %c0_i32_0 = arith.constant 0 : i32
    %c0_i32_1 = arith.constant 0 : i32
    return %c0_i32, %c0_i32_0 : i32, i32
  }
  func.func @transform_2(%arg0: i32, %arg1: memref<2xi32, #tpu.memory_space<smem>>) -> (i32, i32) {
    %c0_i32 = arith.constant 0 : i32
    %c0_i32_0 = arith.constant 0 : i32
    return %arg0, %c0_i32 : i32, i32
  }
  func.func @transform_3(%arg0: i32, %arg1: memref<2xi32, #tpu.memory_space<smem>>) -> (i32, i32) {
    %c0_i32 = arith.constant 0 : i32
    %c0_i32_0 = arith.constant 0 : i32
    return %arg0, %c0_i32 : i32, i32
  }
  func.func @transform_4(%arg0: i32, %arg1: memref<2xi32, #tpu.memory_space<smem>>) -> (i32, i32) {
    %c0_i32 = arith.constant 0 : i32
    %c0_i32_0 = arith.constant 0 : i32
    %c0_i32_1 = arith.constant 0 : i32
    return %c0_i32, %c0_i32_0 : i32, i32
  }
  func.func @transform_5(%arg0: i32, %arg1: memref<2xi32, #tpu.memory_space<smem>>) -> (i32, i32) {
    %c0_i32 = arith.constant 0 : i32
    %c0_i32_0 = arith.constant 0 : i32
    %c0_i32_1 = arith.constant 0 : i32
    return %c0_i32, %c0_i32_0 : i32, i32
  }
  func.func @transform_6(%arg0: i32, %arg1: memref<2xi32, #tpu.memory_space<smem>>) -> (i32, i32) {
    %c0_i32 = arith.constant 0 : i32
    %c0_i32_0 = arith.constant 0 : i32
    return %arg0, %c0_i32 : i32, i32
  }
}

module attributes {stable_mosaic.version = 11 : i64} {
  func.func @_lesion_triplet_kernel(%arg0: i32, %arg1: memref<2xi32, #tpu.memory_space<smem>>, %arg2: memref<128x32xbf16, #tpu.memory_space<vmem>>, %arg3: memref<32x128xbf16, #tpu.memory_space<vmem>>, %arg4: memref<128x1xf32, #tpu.memory_space<vmem>>, %arg5: memref<128x1xf32, #tpu.memory_space<vmem>>, %arg6: memref<128x1xf32, #tpu.memory_space<vmem>>, %arg7: memref<128x2xbf16, #tpu.memory_space<vmem>>, %arg8: memref<128x1xf32, #tpu.memory_space<vmem>>) attributes {dimension_semantics = [#tpu.dimension_semantics<parallel>], iteration_bounds = array<i64: 1>, scalar_prefetch = 1 : i64, scratch_operands = 0 : i64, tpu.core_type = #tpu.core_type<tc>, window_params = [{transform_indices = @transform_0, window_bounds = array<i64: 128, 32>}, {pipeline_mode = #tpu.pipeline_mode<synchronous>, transform_indices = @transform_1, window_bounds = array<i64: 32, 128>}, {transform_indices = @transform_2, window_bounds = array<i64: 128, 1>}, {transform_indices = @transform_3, window_bounds = array<i64: 128, 1>}, {pipeline_mode = #tpu.pipeline_mode<synchronous>, transform_indices = @transform_4, window_bounds = array<i64: 128, 1>}, {pipeline_mode = #tpu.pipeline_mode<synchronous>, transform_indices = @transform_5, window_bounds = array<i64: 128, 2>}, {transform_indices = @transform_6, window_bounds = array<i64: 128, 1>}]} {
    %c0 = arith.constant 0 : index
    %c0_0 = arith.constant 0 : index
    %0 = vector.load %arg2[%c0, %c0_0] : memref<128x32xbf16, #tpu.memory_space<vmem>>, vector<128x32xbf16>
    %c0_1 = arith.constant 0 : index
    %c0_2 = arith.constant 0 : index
    %1 = vector.load %arg3[%c0_1, %c0_2] : memref<32x128xbf16, #tpu.memory_space<vmem>>, vector<32x128xbf16>
    %cst = arith.constant dense<0.000000e+00> : vector<128x128xf32>
    %2 = tpu.matmul %0, %1, %cst {dimension_numbers = #tpu.dot_dimension_numbers<[1], [0], [0], [1], [0, 0, 1, 1], [], []>} : vector<128x32xbf16>, vector<32x128xbf16>, vector<128x128xf32> -> vector<128x128xf32>
    %c0_3 = arith.constant 0 : index
    %c0_4 = arith.constant 0 : index
    %3 = vector.load %arg4[%c0_3, %c0_4] : memref<128x1xf32, #tpu.memory_space<vmem>>, vector<128x1xf32>
    %c0_5 = arith.constant 0 : index
    %c0_6 = arith.constant 0 : index
    %4 = vector.load %arg5[%c0_5, %c0_6] : memref<128x1xf32, #tpu.memory_space<vmem>>, vector<128x1xf32>
    %cst_7 = arith.constant dense<0xFF800000> : vector<128xf32>
    %5 = vector.multi_reduction <maximumf>, %2, %cst_7 [1] : vector<128x128xf32> to vector<128xf32>
    %6 = vector.shape_cast %5 : vector<128xf32> to vector<128x1xf32>
    %7 = vector.broadcast %6 : vector<128x1xf32> to vector<128x128xf32>
    %8 = arith.subf %2, %7 : vector<128x128xf32>
    %9 = math.exp %8 : vector<128x128xf32>
    %c0_8 = arith.constant 0 : index
    %c0_9 = arith.constant 0 : index
    %10 = vector.load %arg6[%c0_8, %c0_9] : memref<128x1xf32, #tpu.memory_space<vmem>>, vector<128x1xf32>
    %cst_10 = arith.constant dense<0.000000e+00> : vector<128x1xf32>
    %11 = tpu.matmul %9, %10, %cst_10 {dimension_numbers = #tpu.dot_dimension_numbers<[1], [0], [0], [1], [0, 0, 1, 1], [], []>} : vector<128x128xf32>, vector<128x1xf32>, vector<128x1xf32> -> vector<128x1xf32>
    %cst_11 = arith.constant 1.000000e-30 : f32
    %12 = vector.broadcast %cst_11 : f32 to vector<128x1xf32>
    %13 = arith.maximumf %11, %12 : vector<128x1xf32>
    %14 = math.log %13 : vector<128x1xf32>
    %15 = arith.addf %6, %14 : vector<128x1xf32>
    %c0_12 = arith.constant 0 : index
    %c0_13 = arith.constant 0 : index
    %16 = vector.load %arg7[%c0_12, %c0_13] : memref<128x2xbf16, #tpu.memory_space<vmem>>, vector<128x2xbf16>
    %17 = arith.extf %16 : vector<128x2xbf16> to vector<128x2xf32>
    %cst_14 = arith.constant dense<0.000000e+00> : vector<128x2xf32>
    %18 = tpu.matmul %2, %17, %cst_14 {dimension_numbers = #tpu.dot_dimension_numbers<[1], [0], [0], [1], [0, 0, 1, 1], [], []>} : vector<128x128xf32>, vector<128x2xf32>, vector<128x2xf32> -> vector<128x2xf32>
    %cst_15 = arith.constant 0.000000e+00 : f32
    %19 = vector.broadcast %cst_15 : f32 to vector<128x1xf32>
    %20 = arith.cmpf oeq, %3, %19 : vector<128x1xf32>
    %21 = vector.extract_strided_slice %18 {offsets = [0, 0], sizes = [128, 1], strides = [1, 1]} : vector<128x2xf32> to vector<128x1xf32>
    %22 = vector.extract_strided_slice %18 {offsets = [0, 1], sizes = [128, 1], strides = [1, 1]} : vector<128x2xf32> to vector<128x1xf32>
    %23 = arith.select %20, %21, %22 : vector<128x1xi1>, vector<128x1xf32>
    %c0_16 = arith.constant 0 : index
    %24 = memref.load %arg1[%c0_16] : memref<2xi32, #tpu.memory_space<smem>>
    %c1 = arith.constant 1 : index
    %25 = memref.load %arg1[%c1] : memref<2xi32, #tpu.memory_space<smem>>
    %26 = vector.broadcast %24 : i32 to vector<128x1xi32>
    %27 = vector.broadcast %25 : i32 to vector<128x1xi32>
    %28 = arith.select %20, %26, %27 : vector<128x1xi1>, vector<128x1xi32>
    %29 = arith.sitofp %28 : vector<128x1xi32> to vector<128x1xf32>
    %30 = arith.mulf %29, %15 : vector<128x1xf32>
    %31 = arith.subf %30, %23 : vector<128x1xf32>
    %cst_17 = arith.constant 3.125000e-02 : f32
    %32 = vector.broadcast %cst_17 : f32 to vector<128x1xf32>
    %33 = arith.mulf %31, %32 : vector<128x1xf32>
    %34 = arith.mulf %33, %4 : vector<128x1xf32>
    %c0_18 = arith.constant 0 : index
    %c0_19 = arith.constant 0 : index
    %35 = vector.load %arg8[%c0_18, %c0_19] : memref<128x1xf32, #tpu.memory_space<vmem>>, vector<128x1xf32>
    tpu.vector_store %arg8[%c0_18, %c0_19], %34 {strides = array<i32>} : memref<128x1xf32, #tpu.memory_space<vmem>>, vector<128x1xf32>,
    return
  }
  func.func @transform_0(%arg0: i32, %arg1: memref<2xi32, #tpu.memory_space<smem>>) -> (i32, i32) {
    %c0_i32 = arith.constant 0 : i32
    %c0_i32_0 = arith.constant 0 : i32
    return %arg0, %c0_i32 : i32, i32
  }
  func.func @transform_1(%arg0: i32, %arg1: memref<2xi32, #tpu.memory_space<smem>>) -> (i32, i32) {
    %c0_i32 = arith.constant 0 : i32
    %c0_i32_0 = arith.constant 0 : i32
    %c0_i32_1 = arith.constant 0 : i32
    return %c0_i32, %c0_i32_0 : i32, i32
  }
  func.func @transform_2(%arg0: i32, %arg1: memref<2xi32, #tpu.memory_space<smem>>) -> (i32, i32) {
    %c0_i32 = arith.constant 0 : i32
    %c0_i32_0 = arith.constant 0 : i32
    return %arg0, %c0_i32 : i32, i32
  }
  func.func @transform_3(%arg0: i32, %arg1: memref<2xi32, #tpu.memory_space<smem>>) -> (i32, i32) {
    %c0_i32 = arith.constant 0 : i32
    %c0_i32_0 = arith.constant 0 : i32
    return %arg0, %c0_i32 : i32, i32
  }
  func.func @transform_4(%arg0: i32, %arg1: memref<2xi32, #tpu.memory_space<smem>>) -> (i32, i32) {
    %c0_i32 = arith.constant 0 : i32
    %c0_i32_0 = arith.constant 0 : i32
    %c0_i32_1 = arith.constant 0 : i32
    return %c0_i32, %c0_i32_0 : i32, i32
  }
  func.func @transform_5(%arg0: i32, %arg1: memref<2xi32, #tpu.memory_space<smem>>) -> (i32, i32) {
    %c0_i32 = arith.constant 0 : i32
    %c0_i32_0 = arith.constant 0 : i32
    %c0_i32_1 = arith.constant 0 : i32
    return %c0_i32, %c0_i32_0 : i32, i32
  }
  func.func @transform_6(%arg0: i32, %arg1: memref<2xi32, #tpu.memory_space<smem>>) -> (i32, i32) {
    %c0_i32 = arith.constant 0 : i32
    %c0_i32_0 = arith.constant 0 : i32
    return %arg0, %c0_i32 : i32, i32
  }
}

</mosaic_0001>

<bundles_post_ra>
// kernel: tpu_custom_call.1
= control target key start
LH: loop header
LB: loop body
LE: loop exit
PB: predicated region body
PF: predicated region fallthrough
CT: control target
= control target key end

     0   :  { %s2186_s0 = inlined_call_operand.vmem [shape: s32[2], index: 0, kind: input, shape index: {}]   ;;  %s2187_s1 = inlined_call_operand.vmem [shape: bf16[128,32], index: 1, kind: input, shape index: {}]   ;;  %s2188_s2 = inlined_call_operand.vmem [shape: bf16[32,128], index: 2, kind: input, shape index: {}]   ;;  %s2189_s3 = inlined_call_operand.vmem [shape: f32[128,1], index: 3, kind: input, shape index: {}]   ;;  %s2190_s4 = inlined_call_operand.vmem [shape: f32[128,1], index: 4, kind: input, shape index: {}]   ;;  %s2191_s5 = inlined_call_operand.vmem [shape: f32[128,1], index: 5, kind: input, shape index: {}]   ;;  %s2192_s6 = inlined_call_operand.vmem [shape: bf16[128,2], index: 6, kind: input, shape index: {}]   ;;  %s2193_s7 = inlined_call_operand.vmem [shape: f32[128,1], index: 7, kind: output, shape index: {}]  }
   0x1   :  { %s12_s26 = sshll.u32 %s2186_s0, 4  ;;  %s13_s26 = int_to_ptr.vmem [resolvable:$true] %s12_s26 }
   0x2   :  { %s1328_s27 = scalar_lea.vmem %s13_s26, 16  ;;  %p1333_p1 = scmp.lt.s32.totalorder %s13_s26, %s13_s26 }
   0x3   :  { %p1329_p0 = scmp.ne.s32.totalorder %s13_s26, %s1328_s27  ;;  %p1334_p2 = scmp.lt.s32.totalorder %s1328_s27, %s1328_s27 }
   0x5   :  { %p1335_p3 = por %p1334_p2, %p1333_p1 }
   0x7   :  { %p1336_p4 = pnand %p1335_p3, %p1329_p0 }
   0x9   :  { %1339 = shalt.err (!%p1336_p4)  }
   0xa   :  { %s1342_s28 = smov [#allocation3]  }
   0xb   :  { %15 = dma.vmem_to_smem %s13_s26, 16, %s1342_s28, [#allocation2] }
   0xc   :  { %1340 = dma.done.wait [#allocation2], 16 }
   0xd   :  { %1341 = vsyncadd [#allocation2], 4294967280 }
   0xe   :  { %17 = sfence }
   0xf   :  { %v1254_v0 = vld [vmem:[%s2188_s2 + $0x8] sm:$0xff]   ;;  %v1255_v1 = vld [vmem:[%s2188_s2] sm:$0xff]   ;;  %vm103_vm0 = vcmask 261120   ;;  %v1258_v4 = vld [vmem:[%s2187_s1 + $0x10] sm:$0xff]   ;;  %s835_s18 = sld [smem:[#allocation3]]  ;;  %vm935_vm12 = vcmask 7168  }
  0x10   :  { %1088 = vmatprep.subr.bf16.mxu0 %v1254_v0  ;;  %v1256_v2 = vld [vmem:[%s2187_s1] sm:$0xff]   ;;  %v1257_v3 = vld [vmem:[%s2187_s1 + $0x8] sm:$0xff]   ;;  %v1013_v5 = vld [vmem:[%s2192_s6 + $0x38] sm:$0xff]   ;;  %s974_s19 = sld [smem:[#allocation3 + $0x1]] }
  0x11   :  { %1089 = vmatpush3.bf16.msra.mxu0 %v1254_v0  ;;  %1092 = vmatprep.mubr.msk.bf16.mxu0 %vm103_vm0, %v1256_v2  ;;  %v1012_v6 = vld [vmem:[%s2192_s6 + $0x30] sm:$0xff]   ;;  %v1411_v7 = vunpack.c.h.bf16 %v1013_v5  ;;  %v1413_v8 = vunpack.c.l.bf16 %v1013_v5  ;;  %v1259_v10 = vld [vmem:[%s2187_s1 + $0x18] sm:$0xff]   ;;  %v1260_v11 = vld [vmem:[%s2187_s1 + $0x20] sm:$0xff]  }
  0x12   :  { %1090 = vmatprep.subr.bf16.mxu0 %v1255_v1  ;;  %v1416_v9 = vunpack.c.h.bf16 %v1012_v6  ;;  %v1011_v12 = vld [vmem:[%s2192_s6 + $0x28] sm:$0xff]   ;;  %v1430_v13 = vunpack.c.l.bf16 %v1012_v6  ;;  %v1010_v15 = vld [vmem:[%s2192_s6 + $0x20] sm:$0xff]   ;;  %v1262_v19 = vld [vmem:[%s2187_s1 + $0x30] sm:$0xff]  }
  0x13   :  { %v1434_v14 = vunpack.c.h.bf16 %v1011_v12  ;;  %v1442_v16 = vunpack.c.l.bf16 %v1011_v12  ;;  %v1261_v17 = vld [vmem:[%s2187_s1 + $0x28] sm:$0xff]   ;;  %v1449_v18 = vunpack.c.h.bf16 %v1010_v15  ;;  %v1009_v20 = vld [vmem:[%s2192_s6 + $0x18] sm:$0xff]   ;;  %v1459_v21 = vunpack.c.l.bf16 %v1010_v15  ;;  %v1008_v23 = vld [vmem:[%s2192_s6 + $0x10] sm:$0xff]  }
  0x14   :  { %v1464_v22 = vunpack.c.h.bf16 %v1009_v20  ;;  %v1472_v24 = vunpack.c.l.bf16 %v1009_v20  ;;  %v1263_v25 = vld [vmem:[%s2187_s1 + $0x38] sm:$0xff]   ;;  %v1479_v26 = vunpack.c.h.bf16 %v1008_v23  ;;  %v1007_v27 = vld [vmem:[%s2192_s6 + $0x8] sm:$0xff]   ;;  %v1486_v28 = vunpack.c.l.bf16 %v1008_v23  ;;  %v976_v31 = vld [vmem:[%s2192_s6] sm:$0xff]  }
  0x15   :  { %1091 = vmatpush3.bf16.msra.mxu0 %v1255_v1  ;;  %v1491_v29 = vunpack.c.h.bf16 %v1007_v27  ;;  %v1498_v30 = vunpack.c.l.bf16 %v1007_v27  ;;  %v1504_v32 = vunpack.c.h.bf16 %v976_v31  ;;  %v1508_v33 = vunpack.c.l.bf16 %v976_v31  ;;  %v352_v34 = vld [vmem:[%s2191_s5 + $0x78] sm:$0xff]  ;;  %v351_v35 = vld [vmem:[%s2191_s5 + $0x70] sm:$0xff]  ;;  %v350_v36 = vld [vmem:[%s2191_s5 + $0x68] sm:$0xff] }
  0x16   :  { %1164 = vmatprep.subr.mxu0 %v1411_v7  ;;  %1108 = vmatprep.subr.mxu1 %v352_v34  ;;  %v349_v37 = vld [vmem:[%s2191_s5 + $0x60] sm:$0xff]  ;;  %v348_v38 = vld [vmem:[%s2191_s5 + $0x58] sm:$0xff]  ;;  %v347_v46 = vld [vmem:[%s2191_s5 + $0x50] sm:$0xff] }
  0x17   :  { %1109 = vmatpush3.msra.mxu1 %v352_v34  ;;  %v346_v48 = vld [vmem:[%s2191_s5 + $0x48] sm:$0xff]  ;;  %v345_v50 = vld [vmem:[%s2191_s5 + $0x40] sm:$0xff]  ;;  %v344_v52 = vld [vmem:[%s2191_s5 + $0x38] sm:$0xff] }
  0x18   :  { %1093 = vmatmul.mubr.msk.bf16.vlgmr.msra.gmra.mxu0 %vm103_vm0, %v1257_v3  ;;  %1110 = vmatprep.subr.mxu1 %v351_v35  ;;  %v343_v55 = vld [vmem:[%s2191_s5 + $0x30] sm:$0xff]  ;;  %v342_v57 = vld [vmem:[%s2191_s5 + $0x28] sm:$0xff]  ;;  %v341_v59 = vld [vmem:[%s2191_s5 + $0x20] sm:$0xff] }
  0x19   :  { %1096 = vmatprep.mubr.msk.bf16.mxu0 %vm103_vm0, %v1258_v4  ;;  %1165 = vmatpush3.msra.mxu0 %v1411_v7  ;;  %v340_v62 = vld [vmem:[%s2191_s5 + $0x18] sm:$0xff]  ;;  %v339_v63 = vld [vmem:[%s2191_s5 + $0x10] sm:$0xff]  ;;  %v338_v0 = vld [vmem:[%s2191_s5 + $0x8] sm:$0xff] }
  0x1a   :  { %1166 = vmatprep.subr.mxu0 %v1413_v8  ;;  %1111 = vmatpush3.msra.mxu1 %v351_v35  ;;  %v337_v1 = vld [vmem:[%s2191_s5] sm:$0xff]  ;;  %s1343_s5 = smov 127  }
  0x1b   :  { %1167 = vmatpush3.msra.mxu0 %v1413_v8  ;;  %1112 = vmatprep.subr.mxu1 %v350_v36 }
  0x1c   :  { %1168 = vmatprep.subr.mxu0 %v1416_v9  ;;  %1113 = vmatpush3.msra.mxu1 %v350_v36 }
  0x1d   :  { %1169 = vmatpush3.msra.mxu0 %v1416_v9  ;;  %1114 = vmatprep.subr.mxu1 %v349_v37 }
  0x1e   :  { %1170 = vmatprep.subr.mxu0 %v1430_v13  ;;  %1115 = vmatpush3.msra.mxu1 %v349_v37 }
  0x1f   :  { %1171 = vmatpush3.msra.mxu0 %v1430_v13  ;;  %1116 = vmatprep.subr.mxu1 %v348_v38 }
  0x20   :  { %1097 = vmatmul.mubr.msk.bf16.gmra.mxu0 %vm103_vm0, %v1259_v10  ;;  %1172 = vmatprep.subr.mxu0 %v1434_v14 }
  0x21   :  { %1100 = vmatprep.mubr.msk.bf16.mxu0 %vm103_vm0, %v1260_v11  ;;  %1173 = vmatpush3.msra.mxu0 %v1434_v14 }
  0x22   :  { %1174 = vmatprep.subr.mxu0 %v1442_v16  ;;  %1117 = vmatpush3.msra.mxu1 %v348_v38 }
  0x23   :  { %1175 = vmatpush3.msra.mxu0 %v1442_v16  ;;  %1118 = vmatprep.subr.mxu1 %v347_v46 }
  0x24   :  { %1176 = vmatprep.subr.mxu0 %v1449_v18  ;;  %1119 = vmatpush3.msra.mxu1 %v347_v46 }
  0x25   :  { %1177 = vmatpush3.msra.mxu0 %v1449_v18  ;;  %1120 = vmatprep.subr.mxu1 %v346_v48 }
  0x26   :  { %1178 = vmatprep.subr.mxu0 %v1459_v21  ;;  %1121 = vmatpush3.msra.mxu1 %v346_v48 }
  0x27   :  { %1179 = vmatpush3.msra.mxu0 %v1459_v21  ;;  %1122 = vmatprep.subr.mxu1 %v345_v50 }
  0x28   :  { %1101 = vmatmul.mubr.msk.bf16.gmra.mxu0 %vm103_vm0, %v1261_v17  ;;  %1180 = vmatprep.subr.mxu0 %v1464_v22 }
  0x29   :  { %1104 = vmatprep.mubr.msk.bf16.mxu0 %vm103_vm0, %v1262_v19  ;;  %1181 = vmatpush3.msra.mxu0 %v1464_v22 }
  0x2a   :  { %1182 = vmatprep.subr.mxu0 %v1472_v24  ;;  %1123 = vmatpush3.msra.mxu1 %v345_v50 }
  0x2b   :  { %1183 = vmatpush3.msra.mxu0 %v1472_v24  ;;  %1124 = vmatprep.subr.mxu1 %v344_v52 }
  0x2c   :  { %1184 = vmatprep.subr.mxu0 %v1479_v26  ;;  %1125 = vmatpush3.msra.mxu1 %v344_v52 }
  0x2d   :  { %1185 = vmatpush3.msra.mxu0 %v1479_v26  ;;  %1126 = vmatprep.subr.mxu1 %v343_v55 }
  0x2e   :  { %1186 = vmatprep.subr.mxu0 %v1486_v28  ;;  %1127 = vmatpush3.msra.mxu1 %v343_v55 }
  0x2f   :  { %1187 = vmatpush3.msra.mxu0 %v1486_v28  ;;  %1128 = vmatprep.subr.mxu1 %v342_v57 }
  0x30   :  { %1105 = vmatmul.mubr.msk.bf16.gmra.mxu0 %vm103_vm0, %v1263_v25  ;;  %1188 = vmatprep.subr.mxu0 %v1491_v29 }
  0x31   :  { %1189 = vmatpush3.msra.mxu0 %v1491_v29  ;;  %1129 = vmatpush3.msra.mxu1 %v342_v57 }
  0x32   :  { %1190 = vmatprep.subr.mxu0 %v1498_v30  ;;  %1130 = vmatprep.subr.mxu1 %v341_v59 }
  0x33   :  { %1191 = vmatpush3.msra.mxu0 %v1498_v30  ;;  %1131 = vmatpush3.msra.mxu1 %v341_v59 }
  0x34   :  { %1192 = vmatprep.subr.mxu0 %v1504_v32  ;;  %1132 = vmatprep.subr.mxu1 %v340_v62 }
  0x35   :  { %1193 = vmatpush3.msra.mxu0 %v1504_v32  ;;  %1133 = vmatpush3.msra.mxu1 %v340_v62 }
  0x36   :  { %1194 = vmatprep.subr.mxu0 %v1508_v33  ;;  %1134 = vmatprep.subr.mxu1 %v339_v63 }
  0x37   :  { %1195 = vmatpush3.msra.mxu0 %v1508_v33  ;;  %1135 = vmatpush3.msra.mxu1 %v339_v63 }
  0x38   :  { %1136 = vmatprep.subr.mxu1 %v338_v0 }
  0x39   :  { %1137 = vmatpush3.msra.mxu1 %v338_v0 }
  0x3a   :  { %1138 = vmatprep.subr.mxu1 %v337_v1 }
  0x3b   :  { %1139 = vmatpush3.msra.mxu1 %v337_v1 }
  0x3c   :  { %1220 = vmatprep.subr.mxu1 %v1411_v7 }
  0xd8   :  { %v1528_v39 = vpop.f32.mrf.mxu0 }
  0xd9   :  { %261 = vmax.xlane.f32.xlu1 %v1528_v39 }
  0xda   :  { %v1531_v40 = vpop.f32.mrf.mxu0 }
  0xdb   :  { %257 = vmax.xlane.f32.xlu0 %v1531_v40  ;;  %1196 = vmatprep.mubr.f32.mxu0 %v1531_v40 }
  0xdc   :  { %v1535_v41 = vpop.f32.mrf.mxu0 }
  0xdd   :  { %263 = vmax.xlane.f32.xlu1 %v1535_v41 }
  0xde   :  { %v1538_v42 = vpop.f32.mrf.mxu0 }
  0xdf   :  { %259 = vmax.xlane.f32.xlu0 %v1538_v42  ;;  %1197 = vmatmul.mubr.f32.vlgmr.msra.gmra.mxu0 %v1538_v42 }
  0xe0   :  { %v1542_v43 = vpop.f32.mrf.mxu0  ;;  %1199 = vmatprep.mubr.f32.mxu0 %v1528_v39 }
  0xe2   :  { %v1545_v44 = vpop.f32.mrf.mxu0 }
  0xe3   :  { %1200 = vmatmul.mubr.f32.gmra.mxu0 %v1535_v41  ;;  %265 = vmax.xlane.f32.xlu0 %v1545_v44 }
  0xe4   :  { %v1549_v45 = vpop.f32.mrf.mxu0  ;;  %1202 = vmatprep.mubr.f32.mxu0 %v1545_v44 }
  0xe6   :  { %v1555_v47 = vpop.f32.mrf.mxu0 }
  0xe7   :  { %269 = vmax.xlane.f32.xlu0 %v1542_v43  ;;  %267 = vmax.xlane.f32.xlu1 %v1555_v47 }
  0xe8   :  { %1203 = vmatmul.mubr.f32.gmra.mxu0 %v1555_v47  ;;  %v1563_v49 = vpop.f32.mrf.mxu0 }
  0xe9   :  { %1205 = vmatprep.mubr.f32.mxu0 %v1542_v43 }
  0xea   :  { %v1569_v51 = vpop.f32.mrf.mxu0 }
  0xeb   :  { %271 = vmax.xlane.f32.xlu1 %v1549_v45  ;;  %273 = vmax.xlane.f32.xlu0 %v1569_v51 }
  0xec   :  { %1206 = vmatmul.mubr.f32.gmra.mxu0 %v1549_v45  ;;  %v1577_v53 = vpop.f32.mrf.mxu0 }
  0xed   :  { %1208 = vmatprep.mubr.f32.mxu0 %v1569_v51 }
  0xee   :  { %v1580_v54 = vpop.f32.mrf.mxu0 }
  0xef   :  { %277 = vmax.xlane.f32.xlu0 %v1563_v49  ;;  %275 = vmax.xlane.f32.xlu1 %v1580_v54 }
  0xf0   :  { %1209 = vmatmul.mubr.f32.gmra.mxu0 %v1580_v54  ;;  %v1588_v56 = vpop.f32.mrf.mxu0 }
  0xf1   :  { %1211 = vmatprep.mubr.f32.mxu0 %v1563_v49 }
  0xf2   :  { %v1594_v58 = vpop.f32.mrf.mxu0 }
  0xf3   :  { %279 = vmax.xlane.f32.xlu1 %v1577_v53  ;;  %281 = vmax.xlane.f32.xlu0 %v1594_v58 }
  0xf4   :  { %1212 = vmatmul.mubr.f32.gmra.mxu0 %v1577_v53  ;;  %v1602_v60 = vpop.f32.mrf.mxu0 }
  0xf5   :  { %1214 = vmatprep.mubr.f32.mxu0 %v1594_v58 }
  0xf6   :  { %v1605_v61 = vpop.f32.mrf.mxu0 }
  0xf7   :  { %285 = vmax.xlane.f32.xlu0 %v1588_v56  ;;  %283 = vmax.xlane.f32.xlu1 %v1605_v61 }
  0xf8   :  { %1215 = vmatmul.mubr.f32.gmra.mxu0 %v1605_v61 }
  0xfb   :  { %287 = vmax.xlane.f32.xlu1 %v1602_v60 }
 0x162   :  { %v1624_v2 = vpop.xlane.xlu1 %261 }
 0x163   :  { %v291_v5 = vsub.f32 %v1528_v39, %v1624_v2 }
 0x164   :  { %v1626_v3 = vpop.xlane.xlu0 %257 }
 0x165   :  { %v289_v4 = vsub.f32 %v1531_v40, %v1626_v3  ;;  %v309_v17 = vmul.f32 1.442695, %v291_v5 }
 0x166   :  { %v1632_v6 = vpop.xlane.xlu1 %263 }
 0x167   :  { %v305_v10 = vmul.f32 1.442695, %v289_v4  ;;  %v292_v11 = vsub.f32 %v1535_v41, %v1632_v6 }
 0x168   :  { %v1636_v12 = vpop.xlane.xlu0 %259 }
 0x169   :  { %1264 = vpow2.f32 %v305_v10  ;;  %v290_v15 = vsub.f32 %v1538_v42, %v1636_v12  ;;  %v311_v20 = vmul.f32 1.442695, %v292_v11 }
 0x16b   :  { %v307_v19 = vmul.f32 1.442695, %v290_v15 }
 0x16c   :  { %v1640_v23 = vpop.xlane.xlu0 %265 }
 0x16d   :  { %1266 = vpow2.f32 %v307_v19  ;;  %v293_v25 = vsub.f32 %v1545_v44, %v1640_v23 }
 0x16e   :  { %1268 = vpow2.f32 %v309_v17 }
 0x16f   :  { %v313_v27 = vmul.f32 1.442695, %v293_v25  ;;  %1270 = vpow2.f32 %v311_v20 }
 0x170   :  { %v1644_v31 = vpop.xlane.xlu0 %269  ;;  %v1646_v34 = vpop.xlane.xlu1 %267 }
 0x171   :  { %1272 = vpow2.f32 %v313_v27  ;;  %v295_v35 = vsub.f32 %v1542_v43, %v1644_v31  ;;  %v294_v36 = vsub.f32 %v1555_v47, %v1646_v34 }
 0x173   :  { %v317_v37 = vmul.f32 1.442695, %v295_v35  ;;  %v315_v38 = vmul.f32 1.442695, %v294_v36 }
 0x174   :  { %v1652_v39 = vpop.xlane.xlu1 %271  ;;  %v1654_v40 = vpop.xlane.xlu0 %273 }
 0x175   :  { %1274 = vpow2.f32 %v317_v37  ;;  %v296_v41 = vsub.f32 %v1549_v45, %v1652_v39  ;;  %v297_v42 = vsub.f32 %v1569_v51, %v1654_v40 }
 0x176   :  { %v1265_v44 = vpop.eup %1264  ;;  %1276 = vpow2.f32 %v315_v38 }
 0x177   :  { %v319_v46 = vmul.f32 1.442695, %v296_v41  ;;  %v321_v43 = vmul.f32 1.442695, %v297_v42  ;;  %1140 = vmatprep.mubr.f32.mxu1 %v1265_v44 }
 0x178   :  { %v1660_v48 = vpop.xlane.xlu0 %277  ;;  %v1662_v47 = vpop.xlane.xlu1 %275 }
 0x179   :  { %1278 = vpow2.f32 %v319_v46  ;;  %v299_v50 = vsub.f32 %v1563_v49, %v1660_v48  ;;  %v298_v52 = vsub.f32 %v1580_v54, %v1662_v47 }
 0x17a   :  { %v1267_v45 = vpop.eup %1266  ;;  %1280 = vpow2.f32 %v321_v43 }
 0x17b   :  { %v1269_v55 = vpop.eup %1268  ;;  %v325_v51 = vmul.f32 1.442695, %v299_v50  ;;  %v323_v57 = vmul.f32 1.442695, %v298_v52  ;;  %1141 = vmatmul.mubr.f32.vlgmr.msra.gmra.mxu1 %v1267_v45  ;;  %v1782_v50 = vld [vmem:[%s2189_s3 + $0x8] sm:$0xff]  ;;  %v1787_v52 = vld [vmem:[%s2189_s3] sm:$0xff] }
 0x17c   :  { %1236 = vmatpush3.msra.mxu1 %v1411_v7  ;;  %1143 = vmatprep.mubr.f32.mxu1 %v1269_v55  ;;  %v1669_v59 = vpop.xlane.xlu1 %279  ;;  %v1671_v62 = vpop.xlane.xlu0 %281  ;;  %v1789_v55 = vstv %s835_s18  ;;  %vm740_vm1 = vcmp.eq.f32.partialorder %v1782_v50, 0.0  ;;  %vm739_vm2 = vcmp.eq.f32.partialorder %v1787_v52, 0.0 }
 0x17d   :  { %2203 = vst [vmem:[#allocation5_spill] sm:$0xff] %v1671_v62  ;;  %v1271_v63 = vpop.eup %1270  ;;  %1282 = vpow2.f32 %v325_v51  ;;  %1221 = vmatprep.subr.mxu1 %v1413_v8  ;;  %v300_v49 = vsub.f32 %v1577_v53, %v1669_v59  ;;  %v301_v54 = vsub.f32 %v1594_v58, %v1671_v62  ;;  %v1791_v51 = vstv %s974_s19 }
 0x17e   :  { %v1273_v0 = vpop.eup %1272  ;;  %1284 = vpow2.f32 %v323_v57  ;;  %1237 = vmatpush3.msra.mxu1 %v1413_v8 }
 0x17f   :  { %v327_v7 = vmul.f32 1.442695, %v300_v49  ;;  %v329_v1 = vmul.f32 1.442695, %v301_v54  ;;  %1222 = vmatprep.subr.mxu1 %v1416_v9  ;;  %1144 = vmatmul.mubr.f32.gmra.mxu1 %v1271_v63  ;;  %v1796_v63 = vld [vmem:[%s2189_s3 + $0x18] sm:$0xff] }
 0x180   :  { %1238 = vmatpush3.msra.mxu1 %v1416_v9  ;;  %1146 = vmatprep.mubr.f32.mxu1 %v1273_v0  ;;  %v1681_v4 = vpop.xlane.xlu0 %285  ;;  %v1683_v5 = vpop.xlane.xlu1 %283  ;;  %v1804_v0 = vsel %vm740_vm1, %v1789_v55, %v1791_v51  ;;  %vm742_vm3 = vcmp.eq.f32.partialorder %v1796_v63, 0.0 }
 0x181   :  { %2204 = vst [vmem:[#allocation6_spill] sm:$0xff] %v1681_v4  ;;  %2205 = vst [vmem:[#allocation7_spill] sm:$0xff] %v1683_v5  ;;  %1286 = vpow2.f32 %v327_v7  ;;  %1223 = vmatprep.subr.mxu1 %v1430_v13  ;;  %v303_v53 = vsub.f32 %v1588_v56, %v1681_v4  ;;  %v302_v8 = vsub.f32 %v1605_v61, %v1683_v5 }
 0x182   :  { %v1275_v58 = vpop.eup %1274  ;;  %1288 = vpow2.f32 %v329_v1  ;;  %1239 = vmatpush3.msra.mxu1 %v1430_v13  ;;  %v1810_v7 = vsel %vm739_vm2, %v1789_v55, %v1791_v51 }
 0x183   :  { %v1277_v10 = vpop.eup %1276  ;;  %v333_v9 = vmul.f32 1.442695, %v303_v53  ;;  %v331_v11 = vmul.f32 1.442695, %v302_v8  ;;  %1224 = vmatprep.subr.mxu1 %v1434_v14  ;;  %v1818_v53 = vld [vmem:[%s2189_s3 + $0x10] sm:$0xff]  ;;  %v1823_v8 = vld [vmem:[%s2189_s3 + $0x20] sm:$0xff] }
 0x184   :  { %1147 = vmatmul.mubr.f32.gmra.mxu1 %v1277_v10  ;;  %v1692_v15 = vpop.xlane.xlu1 %287  ;;  %v1829_v10 = vsel %vm742_vm3, %v1789_v55, %v1791_v51  ;;  %vm741_vm4 = vcmp.eq.f32.partialorder %v1818_v53, 0.0  ;;  %vm743_vm5 = vcmp.eq.f32.partialorder %v1823_v8, 0.0 }
 0x185   :  { %2206 = vst [vmem:[#allocation8_spill] sm:$0xff] %v1692_v15  ;;  %1290 = vpow2.f32 %v333_v9  ;;  %1240 = vmatpush3.msra.mxu1 %v1434_v14  ;;  %1149 = vmatprep.mubr.f32.mxu1 %v1275_v58  ;;  %v304_v17 = vsub.f32 %v1602_v60, %v1692_v15  ;;  %v1834_v9 = vld [vmem:[%s2189_s3 + $0x28] sm:$0xff]  ;;  %v2212_v15 = vcvt.s32.f32 %v1810_v7 }
 0x186   :  { %v1279_v61 = vpop.eup %1278  ;;  %1292 = vpow2.f32 %v331_v11  ;;  %1225 = vmatprep.subr.mxu1 %v1442_v16  ;;  %vm744_vm6 = vcmp.eq.f32.partialorder %v1834_v9, 0.0 }
 0x187   :  { %v1281_v13 = vpop.eup %1280  ;;  %v335_v19 = vmul.f32 1.442695, %v304_v17  ;;  %1241 = vmatpush3.msra.mxu1 %v1442_v16  ;;  %v856_v17 = vcvt.s32.f32 %v1804_v0 }
 0x188   :  { %1226 = vmatprep.subr.mxu1 %v1449_v18  ;;  %1150 = vmatmul.mubr.f32.gmra.mxu1 %v1279_v61 }
 0x189   :  { %1294 = vpow2.f32 %v335_v19  ;;  %1242 = vmatpush3.msra.mxu1 %v1449_v18  ;;  %1152 = vmatprep.mubr.f32.mxu1 %v1281_v13  ;;  %v1841_v13 = vld [vmem:[%s2189_s3 + $0x30] sm:$0xff]  ;;  %v1846_v19 = vld [vmem:[%s2189_s3 + $0x38] sm:$0xff] }
 0x18a   :  { %v1283_v14 = vpop.eup %1282  ;;  %1227 = vmatprep.subr.mxu1 %v1459_v21  ;;  %vm745_vm7 = vcmp.eq.f32.partialorder %v1841_v13, 0.0  ;;  %vm746_vm8 = vcmp.eq.f32.partialorder %v1846_v19, 0.0 }
 0x18b   :  { %v1285_v20 = vpop.eup %1284  ;;  %1243 = vmatpush3.msra.mxu1 %v1459_v21 }
 0x18c   :  { %1228 = vmatprep.subr.mxu1 %v1464_v22  ;;  %1153 = vmatmul.mubr.f32.gmra.mxu1 %v1285_v20  ;;  %v1853_v20 = vld [vmem:[%s2189_s3 + $0x40] sm:$0xff] }
 0x18d   :  { %1244 = vmatpush3.msra.mxu1 %v1464_v22  ;;  %1155 = vmatprep.mubr.f32.mxu1 %v1283_v14  ;;  %vm747_vm9 = vcmp.eq.f32.partialorder %v1853_v20, 0.0 }
 0x18e   :  { %v1287_v16 = vpop.eup %1286  ;;  %1229 = vmatprep.subr.mxu1 %v1472_v24  ;;  %v1901_v0 = vsel %vm747_vm9, %v1789_v55, %v1791_v51 }
 0x18f   :  { %v1289_v25 = vpop.eup %1288  ;;  %1245 = vmatpush3.msra.mxu1 %v1472_v24 }
 0x190   :  { %1230 = vmatprep.subr.mxu1 %v1479_v26  ;;  %1156 = vmatmul.mubr.f32.gmra.mxu1 %v1287_v16 }
 0x191   :  { %1246 = vmatpush3.msra.mxu1 %v1479_v26  ;;  %1158 = vmatprep.mubr.f32.mxu1 %v1289_v25 }
 0x192   :  { %v1291_v18 = vpop.eup %1290  ;;  %1231 = vmatprep.subr.mxu1 %v1486_v28 }
 0x193   :  { %v1293_v21 = vpop.eup %1292  ;;  %1247 = vmatpush3.msra.mxu1 %v1486_v28 }
 0x194   :  { %1232 = vmatprep.subr.mxu1 %v1491_v29  ;;  %1159 = vmatmul.mubr.f32.gmra.mxu1 %v1293_v21  ;;  %v1866_v21 = vsel %vm743_vm5, %v1789_v55, %v1791_v51 }
 0x195   :  { %1248 = vmatpush3.msra.mxu1 %v1491_v29  ;;  %1161 = vmatprep.mubr.f32.mxu1 %v1291_v18  ;;  %v1860_v18 = vsel %vm741_vm4, %v1789_v55, %v1791_v51  ;;  %v2215_v9 = vcvt.s32.f32 %v1866_v21 }
 0x196   :  { %v1295_v22 = vpop.eup %1294  ;;  %1233 = vmatprep.subr.mxu1 %v1498_v30 }
 0x197   :  { %1249 = vmatpush3.msra.mxu1 %v1498_v30 }
 0x198   :  { %1234 = vmatprep.subr.mxu1 %v1504_v32  ;;  %1162 = vmatmul.mubr.f32.gmra.mxu1 %v1295_v22  ;;  %v1872_v22 = vld [vmem:[%s2189_s3 + $0x48] sm:$0xff] }
 0x199   :  { %1250 = vmatpush3.msra.mxu1 %v1504_v32  ;;  %1217 = vmatprep.mubr.f32.mxu1 %v1588_v56  ;;  %vm748_vm10 = vcmp.eq.f32.partialorder %v1872_v22, 0.0 }
 0x19a   :  { %1235 = vmatprep.subr.mxu1 %v1508_v33 }
 0x19b   :  { %1251 = vmatpush3.msra.mxu1 %v1508_v33 }
 0x19c   :  { %1218 = vmatmul.mubr.f32.vlgmr.msra.gmra.mxu1 %v1602_v60 }
 0x19f   :  { %v1721_v24 = vpop.f32.mrf.mxu0 }
 0x1a0   :  { %773 = vrot.lane.b32.xlu1 %v1721_v24, %s1343_s5 }
 0x1a1   :  { %v1725_v26 = vpop.f32.mrf.mxu0 }
 0x1a2   :  { %771 = vrot.lane.b32.xlu0 %v1725_v26, %s1343_s5 }
 0x1a3   :  { %v1729_v28 = vpop.f32.mrf.mxu0 }
 0x1a4   :  { %777 = vrot.lane.b32.xlu1 %v1729_v28, %s1343_s5 }
 0x1a5   :  { %v1733_v29 = vpop.f32.mrf.mxu0 }
 0x1a8   :  { %v1735_v30 = vpop.f32.mrf.mxu0  ;;  %775 = vrot.lane.b32.xlu1 %v1733_v29, %s1343_s5 }
 0x1aa   :  { %v1739_v32 = vpop.f32.mrf.mxu0 }
 0x1ab   :  { %779 = vrot.lane.b32.xlu0 %v1739_v32, %s1343_s5 }
 0x1ac   :  { %v1743_v33 = vpop.f32.mrf.mxu0  ;;  %781 = vrot.lane.b32.xlu1 %v1735_v30, %s1343_s5 }
 0x1ae   :  { %v1747_v56 = vpop.f32.mrf.mxu0 }
 0x1af   :  { %783 = vrot.lane.b32.xlu0 %v1747_v56, %s1343_s5 }
 0x1b0   :  { %v1751_v60 = vpop.f32.mrf.mxu0  ;;  %785 = vrot.lane.b32.xlu1 %v1743_v33, %s1343_s5 }
 0x1b2   :  { %v1755_v27 = vpop.f32.mrf.mxu0 }
 0x1b3   :  { %787 = vrot.lane.b32.xlu0 %v1755_v27, %s1343_s5 }
 0x1b4   :  { %v1759_v35 = vpop.f32.mrf.mxu0  ;;  %789 = vrot.lane.b32.xlu1 %v1751_v60, %s1343_s5 }
 0x1b5   :  { %2207 = vst [vmem:[#allocation9_spill] sm:$0xff] %v1759_v35 }
 0x1b6   :  { %v1763_v36 = vpop.f32.mrf.mxu0 }
 0x1b7   :  { %2208 = vst [vmem:[#allocation10_spill] sm:$0xff] %v1763_v36  ;;  %791 = vrot.lane.b32.xlu0 %v1763_v36, %s1343_s5 }
 0x1b8   :  { %v1767_v37 = vpop.f32.mrf.mxu0  ;;  %793 = vrot.lane.b32.xlu1 %v1759_v35, %s1343_s5 }
 0x1b9   :  { %2209 = vst [vmem:[#allocation11_spill] sm:$0xff] %v1767_v37 }
 0x1ba   :  { %v1771_v38 = vpop.f32.mrf.mxu0 }
 0x1bb   :  { %2210 = vst [vmem:[#allocation12_spill] sm:$0xff] %v1771_v38  ;;  %795 = vrot.lane.b32.xlu0 %v1771_v38, %s1343_s5 }
 0x1bc   :  { %797 = vrot.lane.b32.xlu1 %v1767_v37, %s1343_s5 }
 0x212   :  { %v1777_v44 = vpop.permute.xlu1 %773 }
 0x216   :  { %v1812_v1 = vpop.permute.xlu1 %777 }
 0x23b   :  { %v1142_v41 = vpop.f32.mrf.mxu1 }
 0x23c   :  { %v499_v42 = vmax.f32 %v1142_v41, 1e-30 }
 0x23d   :  { %v419_v46 = vpop.f32.mrf.mxu1 }
 0x23e   :  { %1296 = vlog2.f32 %v499_v42  ;;  %v498_v43 = vmax.f32 %v419_v46, 1e-30  ;;  %v1874_v42 = vpop.permute.xlu1 %775 }
 0x23f   :  { %v1145_v45 = vpop.f32.mrf.mxu1 }
 0x240   :  { %1298 = vlog2.f32 %v498_v43  ;;  %v501_v57 = vmax.f32 %v1145_v45, 1e-30  ;;  %v1882_v43 = vsel %vm744_vm6, %v1789_v55, %v1791_v51  ;;  %v1888_v45 = vsel %vm745_vm7, %v1789_v55, %v1791_v51 }
 0x241   :  { %v429_v49 = vpop.f32.mrf.mxu1 }
 0x242   :  { %1300 = vlog2.f32 %v501_v57  ;;  %v500_v54 = vmax.f32 %v429_v49, 1e-30  ;;  %v1894_v57 = vsel %vm746_vm8, %v1789_v55, %v1791_v51  ;;  %v1922_v35 = vpop.permute.xlu1 %781 }
 0x244   :  { %1302 = vlog2.f32 %v500_v54  ;;  %v1148_v58 = vpop.f32.mrf.mxu1 }
 0x245   :  { %v503_v11 = vmax.f32 %v1148_v58, 1e-30 }
 0x246   :  { %v439_v14 = vpop.f32.mrf.mxu1  ;;  %v786_v63 = vpop.permute.xlu1 %785 }
 0x247   :  { %1304 = vlog2.f32 %v503_v11  ;;  %v502_v16 = vmax.f32 %v439_v14, 1e-30  ;;  %v857_v11 = vcvt.s32.f32 %v1860_v18 }
 0x248   :  { %v1151_v41 = vpop.f32.mrf.mxu1 }
 0x249   :  { %1306 = vlog2.f32 %v502_v16  ;;  %v505_v46 = vmax.f32 %v1151_v41, 1e-30  ;;  %v1910_v16 = vsel %vm748_vm10, %v1789_v55, %v1791_v51  ;;  %v1915_v41 = vld [vmem:[%s2189_s3 + $0x50] sm:$0xff] }
 0x24a   :  { %v449_v49 = vpop.f32.mrf.mxu1  ;;  %2211 = vst [vmem:[#allocation13_spill] sm:$0xff] %v1915_v41  ;;  %vm749_vm11 = vcmp.eq.f32.partialorder %v1915_v41, 0.0 }
 0x24b   :  { %v1297_v54 = vpop.eup %1296  ;;  %1308 = vlog2.f32 %v505_v46  ;;  %v504_v58 = vmax.f32 %v449_v49, 1e-30  ;;  %v772_v46 = vpop.permute.xlu0 %771 }
 0x24c   :  { %v517_v25 = vmul.f32 0.6931472, %v1297_v54  ;;  %v1154_v61 = vpop.f32.mrf.mxu1  ;;  %v820_v54 = vsel %vm740_vm1, %v1721_v24, %v1777_v44  ;;  %v822_v24 = vsel %vm742_vm3, %v1729_v28, %v1812_v1  ;;  %v242_v44 = vld [vmem:[%s2190_s4 + $0x8] sm:$0xff]  ;;  %v821_v28 = vsel %vm741_vm4, %v1733_v29, %v1874_v42  ;;  %v1962_v1 = vld [vmem:[%s2189_s3 + $0x58] sm:$0xff] }
 0x24d   :  { %v1299_v4 = vpop.eup %1298  ;;  %1310 = vlog2.f32 %v504_v58  ;;  %v507_v14 = vmax.f32 %v1154_v61, 1e-30  ;;  %v1930_v61 = vsel %vm749_vm11, %v1789_v55, %v1791_v51  ;;  %v244_v42 = vld [vmem:[%s2190_s4 + $0x18] sm:$0xff]  ;;  %vm750_vm13 = vcmp.eq.f32.partialorder %v1962_v1, 0.0 }
 0x24e   :  { %v547_v37 = vadd.f32 %v517_v25, %v1636_v12  ;;  %v515_v62 = vmul.f32 0.6931472, %v1299_v4  ;;  %v459_v36 = vpop.f32.mrf.mxu1 }
 0x24f   :  { %v1301_v5 = vpop.eup %1300  ;;  %1312 = vlog2.f32 %v507_v14  ;;  %v506_v49 = vmax.f32 %v459_v36, 1e-30  ;;  %v1937_v18 = vpop.permute.xlu0 %779 }
 0x250   :  { %v872_v58 = vmul.f32 %v856_v17, %v547_v37  ;;  %v546_v12 = vadd.f32 %v515_v62, %v1626_v3  ;;  %v521_v4 = vmul.f32 0.6931472, %v1301_v5  ;;  %v1157_v25 = vpop.f32.mrf.mxu1  ;;  %v819_v5 = vsel %vm739_vm2, %v1725_v26, %v772_v46 }
 0x251   :  { %v1303_v38 = vpop.eup %1302  ;;  %1314 = vlog2.f32 %v506_v49  ;;  %v509_v36 = vmax.f32 %v1157_v25, 1e-30 }
 0x252   :  { %v888_v14 = vsub.f32 %v872_v58, %v820_v54  ;;  %v871_v41 = vmul.f32 %v2212_v15, %v546_v12  ;;  %v549_v37 = vadd.f32 %v521_v4, %v1632_v6  ;;  %v519_v3 = vmul.f32 0.6931472, %v1303_v38  ;;  %v469_v62 = vpop.f32.mrf.mxu1 }
 0x253   :  { %1316 = vlog2.f32 %v509_v36  ;;  %v508_v50 = vmax.f32 %v469_v62, 1e-30  ;;  %v2213_v38 = vcvt.s32.f32 %v1829_v10  ;;  %v784_v29 = vpop.permute.xlu0 %783 }
 0x254   :  { %v1305_v15 = vpop.eup %1304  ;;  %v904_v7 = vmul.f32 0.03125, %v888_v14  ;;  %v887_v6 = vsub.f32 %v871_v41, %v819_v5  ;;  %v548_v52 = vadd.f32 %v519_v3, %v1624_v2  ;;  %v1160_v26 = vpop.f32.mrf.mxu1  ;;  %v241_v41 = vld [vmem:[%s2190_s4] sm:$0xff]  ;;  %v243_v5 = vld [vmem:[%s2190_s4 + $0x10] sm:$0xff] }
 0x255   :  { %v874_v17 = vmul.f32 %v2213_v38, %v549_v37  ;;  %v525_v10 = vmul.f32 0.6931472, %v1305_v15  ;;  %1318 = vlog2.f32 %v508_v50  ;;  %v511_v46 = vmax.f32 %v1160_v26, 1e-30 }
 0x256   :  { %v1307_v2 = vpop.eup %1306  ;;  %v920_v49 = vmul.f32 %v904_v7, %v242_v44  ;;  %v903_v54 = vmul.f32 0.03125, %v887_v6  ;;  %v873_v12 = vmul.f32 %v857_v11, %v548_v52  ;;  %v479_v53 = vpop.f32.mrf.mxu1  ;;  %v824_v6 = vsel %vm744_vm6, %v1735_v30, %v1922_v35  ;;  %v2008_v30 = vld [vmem:[%s2189_s3 + $0x68] sm:$0xff] }
 0x257   :  { %v890_v58 = vsub.f32 %v874_v17, %v822_v24  ;;  %v551_v4 = vadd.f32 %v525_v10, %v1646_v34  ;;  %v523_v25 = vmul.f32 0.6931472, %v1307_v2  ;;  %1320 = vlog2.f32 %v511_v46  ;;  %v1981_v34 = vld [vmem:[%s2189_s3 + $0x60] sm:$0xff]  ;;  %v790_v52 = vpop.permute.xlu1 %789 }
 0x258   :  { %v510_v36 = vmax.f32 %v479_v53, 1e-30  ;;  %v1309_v14 = vpop.eup %1308  ;;  %937 = vst.msk [vmem:[%s2193_s7 + $0x8] sm:$0xff] %vm935_vm12, %v920_v49  ;;  %v919_v11 = vmul.f32 %v903_v54, %v241_v41  ;;  %v889_v3 = vsub.f32 %v873_v12, %v821_v28  ;;  %v1976_v62 = vpop.f32.mrf.mxu1  ;;  %v2214_v24 = vcvt.s32.f32 %v1882_v43 }
 0x259   :  { %v906_v37 = vmul.f32 0.03125, %v890_v58  ;;  %v550_v50 = vadd.f32 %v523_v25, %v1640_v23  ;;  %v529_v15 = vmul.f32 0.6931472, %v1309_v14  ;;  %v1997_v38 = vsel %vm750_vm13, %v1789_v55, %v1791_v51  ;;  %v788_v54 = vpop.permute.xlu0 %787 }
 0x25a   :  { %v876_v44 = vmul.f32 %v2214_v24, %v551_v4  ;;  %1322 = vlog2.f32 %v510_v36  ;;  %v1311_v7 = vpop.eup %1310  ;;  %936 = vst.msk [vmem:[%s2193_s7] sm:$0xff] %vm935_vm12, %v919_v11  ;;  %v905_v43 = vmul.f32 0.03125, %v889_v3  ;;  %v2003_v17 = vpop.f32.mrf.mxu1  ;;  %v823_v46 = vsel %vm743_vm5, %v1739_v32, %v1937_v18 }
 0x25b   :  { %v922_v23 = vmul.f32 %v906_v37, %v244_v42  ;;  %v875_v26 = vmul.f32 %v2215_v9, %v550_v50  ;;  %v553_v28 = vadd.f32 %v529_v15, %v1652_v39  ;;  %v527_v41 = vmul.f32 0.6931472, %v1311_v7  ;;  %v246_v39 = vld [vmem:[%s2190_s4 + $0x28] sm:$0xff] }
 0x25c   :  { %v892_v35 = vsub.f32 %v876_v44, %v824_v6  ;;  %v1313_v10 = vpop.eup %1312  ;;  %v865_v2 = vcvt.s32.f32 %v1930_v61  ;;  %vm751_vm14 = vcmp.eq.f32.partialorder %v1981_v34, 0.0  ;;  %v921_v21 = vmul.f32 %v905_v43, %v243_v5  ;;  %v2026_v49 = vpop.f32.mrf.mxu1  ;;  %v248_v5 = vld [vmem:[%s2190_s4 + $0x38] sm:$0xff]  ;;  %v247_v6 = vld [vmem:[%s2190_s4 + $0x30] sm:$0xff]  ;;  %v253_v34 = vld [vmem:[%s2190_s4 + $0x60] sm:$0xff] }
 0x25d   :  { %939 = vst.msk [vmem:[%s2193_s7 + $0x18] sm:$0xff] %vm935_vm12, %v922_v23  ;;  %v891_v8 = vsub.f32 %v875_v26, %v823_v46  ;;  %v2216_v32 = vcvt.s32.f32 %v1894_v57  ;;  %v552_v12 = vadd.f32 %v527_v41, %v1644_v31  ;;  %801 = vrot.lane.b32.xlu1 %v2026_v49, %s1343_s5  ;;  %v826_v42 = vsel %vm746_vm8, %v1743_v33, %v786_v63  ;;  %v245_v31 = vld [vmem:[%s2190_s4 + $0x20] sm:$0xff]  ;;  %v794_v44 = vpop.permute.xlu1 %793 }
 0x25e   :  { %v908_v58 = vmul.f32 0.03125, %v892_v35  ;;  %v1315_v53 = vpop.eup %1314  ;;  %v866_v4 = vcvt.s32.f32 %v1997_v38  ;;  %vm752_vm15 = vcmp.eq.f32.partialorder %v2008_v30, 0.0  ;;  %938 = vst.msk [vmem:[%s2193_s7 + $0x10] sm:$0xff] %vm935_vm12, %v921_v21  ;;  %v533_v57 = vmul.f32 0.6931472, %v1313_v10  ;;  %v2045_v25 = vpop.f32.mrf.mxu1  ;;  %v254_v30 = vld [vmem:[%s2190_s4 + $0x68] sm:$0xff] }
 0x25f   :  { %v878_v18 = vmul.f32 %v2216_v32, %v553_v28  ;;  %v907_v14 = vmul.f32 0.03125, %v891_v8  ;;  %v2217_v33 = vcvt.s32.f32 %v1888_v45  ;;  %799 = vrot.lane.b32.xlu0 %v2045_v25, %s1343_s5  ;;  %v825_v37 = vsel %vm745_vm7, %v1747_v56, %v784_v29  ;;  %v792_v35 = vpop.permute.xlu0 %791 }
 0x260   :  { %v924_v36 = vmul.f32 %v908_v58, %v246_v39  ;;  %v1317_v11 = vpop.eup %1316  ;;  %v852_v3 = vsel %vm752_vm15, %v1789_v55, %v1791_v51  ;;  %v555_v45 = vadd.f32 %v533_v57, %v1662_v47  ;;  %v531_v24 = vmul.f32 0.6931472, %v1315_v53 }
 0x261   :  { %v894_v19 = vsub.f32 %v878_v18, %v826_v42  ;;  %v877_v63 = vmul.f32 %v2217_v33, %v552_v12  ;;  %v923_v13 = vmul.f32 %v907_v14, %v245_v31  ;;  %v537_v50 = vmul.f32 0.6931472, %v1317_v11  ;;  %v798_v18 = vpop.permute.xlu1 %797  ;;  %v249_v12 = vld [vmem:[%s2190_s4 + $0x40] sm:$0xff]  ;;  %v2221_v42 = vld [vmem:[#allocation7_spill] sm:$0xff]  ;;  %v2222_v31 = vld [vmem:[#allocation10_spill] sm:$0xff] }
 0x262   :  { %941 = vst.msk [vmem:[%s2193_s7 + $0x28] sm:$0xff] %vm935_vm12, %v924_v36  ;;  %v1319_v15 = vpop.eup %1318  ;;  %v828_v7 = vsel %vm748_vm10, %v1751_v60, %v790_v52  ;;  %v851_v47 = vsel %vm751_vm14, %v1789_v55, %v1791_v51  ;;  %v2218_v38 = vcvt.s32.f32 %v1910_v16  ;;  %v554_v43 = vadd.f32 %v531_v24, %v1654_v40  ;;  %v252_v33 = vld [vmem:[%s2190_s4 + $0x58] sm:$0xff] }
 0x263   :  { %v910_v56 = vmul.f32 0.03125, %v894_v19  ;;  %v893_v29 = vsub.f32 %v877_v63, %v825_v37  ;;  %940 = vst.msk [vmem:[%s2193_s7 + $0x20] sm:$0xff] %vm935_vm12, %v923_v13  ;;  %v557_v52 = vadd.f32 %v537_v50, %v1669_v59  ;;  %v535_v9 = vmul.f32 0.6931472, %v1319_v15  ;;  %v250_v59 = vld [vmem:[%s2190_s4 + $0x48] sm:$0xff]  ;;  %v796_v63 = vpop.permute.xlu0 %795  ;;  %v2226_v15 = vld [vmem:[#allocation12_spill] sm:$0xff] }
 0x264   :  { %v880_v23 = vmul.f32 %v2218_v38, %v555_v45  ;;  %v1321_v26 = vpop.eup %1320  ;;  %v827_v28 = vsel %vm747_vm9, %v1755_v27, %v788_v54  ;;  %v868_v16 = vcvt.s32.f32 %v852_v3  ;;  %v2219_v40 = vcvt.s32.f32 %v1901_v0  ;;  %v2220_v54 = vld [vmem:[#allocation9_spill] sm:$0xff] }
 0x265   :  { %v926_v60 = vmul.f32 %v910_v56, %v248_v5  ;;  %v909_v22 = vmul.f32 0.03125, %v893_v29  ;;  %v882_v21 = vmul.f32 %v866_v4, %v557_v52  ;;  %v556_v39 = vadd.f32 %v535_v9, %v1660_v48  ;;  %v2224_v5 = vld [vmem:[#allocation5_spill] sm:$0xff]  ;;  %v240_v52 = vld [vmem:[%s2189_s3 + $0x78] sm:$0xff] }
 0x266   :  { %v896_v41 = vsub.f32 %v880_v23, %v828_v7  ;;  %v879_v10 = vmul.f32 %v2219_v40, %v554_v43  ;;  %v541_v20 = vmul.f32 0.6931472, %v1321_v26  ;;  %v830_v0 = vsel %vm750_vm13, %v2220_v54, %v794_v44  ;;  %v251_v44 = vld [vmem:[%s2190_s4 + $0x50] sm:$0xff]  ;;  %v2227_v40 = vld [vmem:[#allocation8_spill] sm:$0xff] }
 0x267   :  { %943 = vst.msk [vmem:[%s2193_s7 + $0x38] sm:$0xff] %vm935_vm12, %v926_v60  ;;  %v925_v46 = vmul.f32 %v909_v22, %v247_v6  ;;  %v1323_v27 = vpop.eup %1322  ;;  %v867_v58 = vcvt.s32.f32 %v851_v47  ;;  %v898_v48 = vsub.f32 %v882_v21, %v830_v0  ;;  %v881_v53 = vmul.f32 %v865_v2, %v556_v39  ;;  %v2225_v2 = vld [vmem:[#allocation11_spill] sm:$0xff] }
 0x268   :  { %v912_v8 = vmul.f32 0.03125, %v896_v41  ;;  %v895_v32 = vsub.f32 %v879_v10, %v827_v28  ;;  %v559_v1 = vadd.f32 %v541_v20, %v2221_v42  ;;  %v539_v4 = vmul.f32 0.6931472, %v1323_v27  ;;  %v239_v26 = vld [vmem:[%s2189_s3 + $0x70] sm:$0xff] }
 0x269   :  { %942 = vst.msk [vmem:[%s2193_s7 + $0x30] sm:$0xff] %vm935_vm12, %v925_v46  ;;  %v829_v36 = vsel %vm749_vm11, %v2222_v31, %v792_v35  ;;  %v914_v11 = vmul.f32 0.03125, %v898_v48  ;;  %v832_v45 = vsel %vm752_vm15, %v2225_v2, %v798_v18  ;;  %v831_v7 = vsel %vm751_vm14, %v2226_v15, %v796_v63 }
 0x26a   :  { %v928_v14 = vmul.f32 %v912_v8, %v250_v59  ;;  %v911_v19 = vmul.f32 0.03125, %v895_v32  ;;  %v897_v37 = vsub.f32 %v881_v53, %v829_v36  ;;  %v884_v3 = vmul.f32 %v868_v16, %v559_v1  ;;  %v2228_v59 = vld [vmem:[#allocation6_spill] sm:$0xff]  ;;  %v256_v32 = vld [vmem:[%s2190_s4 + $0x78] sm:$0xff] }
 0x26b   :  { %v558_v61 = vadd.f32 %v539_v4, %v2224_v5  ;;  %v930_v13 = vmul.f32 %v914_v11, %v252_v33  ;;  %v513_v60 = vmax.f32 %v1976_v62, 1e-30  ;;  %v512_v22 = vmax.f32 %v2003_v17, 1e-30 }
 0x26c   :  { %945 = vst.msk [vmem:[%s2193_s7 + $0x48] sm:$0xff] %vm935_vm12, %v928_v14  ;;  %v927_v24 = vmul.f32 %v911_v19, %v249_v12  ;;  %v913_v56 = vmul.f32 0.03125, %v897_v37  ;;  %v900_v29 = vsub.f32 %v884_v3, %v832_v45  ;;  %vm754_vm0 = vcmp.eq.f32.partialorder %v240_v52, 0.0  ;;  %v255_v12 = vld [vmem:[%s2190_s4 + $0x70] sm:$0xff] }
 0x26d   :  { %v883_v50 = vmul.f32 %v867_v58, %v558_v61  ;;  %947 = vst.msk [vmem:[%s2193_s7 + $0x58] sm:$0xff] %vm935_vm12, %v930_v13  ;;  %1324 = vlog2.f32 %v513_v60  ;;  %vm753_vm1 = vcmp.eq.f32.partialorder %v239_v26, 0.0  ;;  %v854_v62 = vsel %vm754_vm0, %v1789_v55, %v1791_v51 }
 0x26e   :  { %944 = vst.msk [vmem:[%s2193_s7 + $0x40] sm:$0xff] %vm935_vm12, %v927_v24  ;;  %v929_v47 = vmul.f32 %v913_v56, %v251_v44  ;;  %v916_v6 = vmul.f32 0.03125, %v900_v29  ;;  %1326 = vlog2.f32 %v512_v22  ;;  %v853_v17 = vsel %vm753_vm1, %v1789_v55, %v1791_v51 }
 0x26f   :  { %v899_v38 = vsub.f32 %v883_v50, %v831_v7  ;;  %v870_v46 = vcvt.s32.f32 %v854_v62  ;;  %v869_v39 = vcvt.s32.f32 %v853_v17 }
 0x270   :  { %946 = vst.msk [vmem:[%s2193_s7 + $0x50] sm:$0xff] %vm935_vm12, %v929_v47  ;;  %v932_v23 = vmul.f32 %v916_v6, %v254_v30 }
 0x271   :  { %v915_v43 = vmul.f32 0.03125, %v899_v38 }
 0x272   :  { %949 = vst.msk [vmem:[%s2193_s7 + $0x68] sm:$0xff] %vm935_vm12, %v932_v23 }
 0x273   :  { %v931_v35 = vmul.f32 %v915_v43, %v253_v34 }
 0x275   :  { %948 = vst.msk [vmem:[%s2193_s7 + $0x60] sm:$0xff] %vm935_vm12, %v931_v35 }
 0x27a   :  { %v1325_v9 = vpop.eup %1324 }
 0x27b   :  { %v1327_v28 = vpop.eup %1326  ;;  %v545_v16 = vmul.f32 0.6931472, %v1325_v9 }
 0x27c   :  { %v543_v41 = vmul.f32 0.6931472, %v1327_v28 }
 0x27d   :  { %v561_v10 = vadd.f32 %v545_v16, %v2227_v40 }
 0x27e   :  { %v560_v21 = vadd.f32 %v543_v41, %v2228_v59 }
 0x27f   :  { %v886_v20 = vmul.f32 %v870_v46, %v561_v10 }
 0x280   :  { %v885_v58 = vmul.f32 %v869_v39, %v560_v21 }
 0x2cf   :  { %v802_v27 = vpop.permute.xlu1 %801 }
 0x2d0   :  { %v834_v54 = vsel %vm754_vm0, %v2026_v49, %v802_v27 }
 0x2d1   :  { %v902_v0 = vsub.f32 %v886_v20, %v834_v54  ;;  %v800_v8 = vpop.permute.xlu0 %799 }
 0x2d2   :  { %v833_v18 = vsel %vm753_vm1, %v2045_v25, %v800_v8 }
 0x2d3   :  { %v918_v55 = vmul.f32 0.03125, %v902_v0  ;;  %v901_v51 = vsub.f32 %v885_v58, %v833_v18 }
 0x2d5   :  { %v934_v48 = vmul.f32 %v918_v55, %v256_v32  ;;  %v917_v53 = vmul.f32 0.03125, %v901_v51 }
 0x2d7   :  { %951 = vst.msk [vmem:[%s2193_s7 + $0x78] sm:$0xff] %vm935_vm12, %v934_v48  ;;  %v933_v49 = vmul.f32 %v917_v53, %v255_v12 }
 0x2d9   :  { %950 = vst.msk [vmem:[%s2193_s7 + $0x70] sm:$0xff] %vm935_vm12, %v933_v49 }

// kernel: tpu_custom_call.1
= control target key start
LH: loop header
LB: loop body
LE: loop exit
PB: predicated region body
PF: predicated region fallthrough
CT: control target
= control target key end

     0   :  { %s2186_s0 = inlined_call_operand.vmem [shape: s32[2], index: 0, kind: input, shape index: {}]   ;;  %s2187_s1 = inlined_call_operand.vmem [shape: bf16[128,32], index: 1, kind: input, shape index: {}]   ;;  %s2188_s2 = inlined_call_operand.vmem [shape: bf16[32,128], index: 2, kind: input, shape index: {}]   ;;  %s2189_s3 = inlined_call_operand.vmem [shape: f32[128,1], index: 3, kind: input, shape index: {}]   ;;  %s2190_s4 = inlined_call_operand.vmem [shape: f32[128,1], index: 4, kind: input, shape index: {}]   ;;  %s2191_s5 = inlined_call_operand.vmem [shape: f32[128,1], index: 5, kind: input, shape index: {}]   ;;  %s2192_s6 = inlined_call_operand.vmem [shape: bf16[128,2], index: 6, kind: input, shape index: {}]   ;;  %s2193_s7 = inlined_call_operand.vmem [shape: f32[128,1], index: 7, kind: output, shape index: {}]  }
   0x1   :  { %s12_s26 = sshll.u32 %s2186_s0, 4  ;;  %s13_s26 = int_to_ptr.vmem [resolvable:$true] %s12_s26 }
   0x2   :  { %s1328_s27 = scalar_lea.vmem %s13_s26, 16  ;;  %p1333_p1 = scmp.lt.s32.totalorder %s13_s26, %s13_s26 }
   0x3   :  { %p1329_p0 = scmp.ne.s32.totalorder %s13_s26, %s1328_s27  ;;  %p1334_p2 = scmp.lt.s32.totalorder %s1328_s27, %s1328_s27 }
   0x5   :  { %p1335_p3 = por %p1334_p2, %p1333_p1 }
   0x7   :  { %p1336_p4 = pnand %p1335_p3, %p1329_p0 }
   0x9   :  { %1339 = shalt.err (!%p1336_p4)  }
   0xa   :  { %s1342_s28 = smov [#allocation3]  }
   0xb   :  { %15 = dma.vmem_to_smem %s13_s26, 16, %s1342_s28, [#allocation2] }
   0xc   :  { %1340 = dma.done.wait [#allocation2], 16 }
   0xd   :  { %1341 = vsyncadd [#allocation2], 4294967280 }
   0xe   :  { %17 = sfence }
   0xf   :  { %v1254_v0 = vld [vmem:[%s2188_s2 + $0x8] sm:$0xff]   ;;  %v1255_v1 = vld [vmem:[%s2188_s2] sm:$0xff]   ;;  %vm103_vm0 = vcmask 261120   ;;  %v1258_v4 = vld [vmem:[%s2187_s1 + $0x10] sm:$0xff]   ;;  %s835_s18 = sld [smem:[#allocation3]]  ;;  %vm935_vm12 = vcmask 7168  }
  0x10   :  { %1088 = vmatprep.subr.bf16.mxu0 %v1254_v0  ;;  %v1256_v2 = vld [vmem:[%s2187_s1] sm:$0xff]   ;;  %v1257_v3 = vld [vmem:[%s2187_s1 + $0x8] sm:$0xff]   ;;  %v1013_v5 = vld [vmem:[%s2192_s6 + $0x38] sm:$0xff]   ;;  %s974_s19 = sld [smem:[#allocation3 + $0x1]] }
  0x11   :  { %1089 = vmatpush3.bf16.msra.mxu0 %v1254_v0  ;;  %1092 = vmatprep.mubr.msk.bf16.mxu0 %vm103_vm0, %v1256_v2  ;;  %v1012_v6 = vld [vmem:[%s2192_s6 + $0x30] sm:$0xff]   ;;  %v1411_v7 = vunpack.c.h.bf16 %v1013_v5  ;;  %v1413_v8 = vunpack.c.l.bf16 %v1013_v5  ;;  %v1259_v10 = vld [vmem:[%s2187_s1 + $0x18] sm:$0xff]   ;;  %v1260_v11 = vld [vmem:[%s2187_s1 + $0x20] sm:$0xff]  }
  0x12   :  { %1090 = vmatprep.subr.bf16.mxu0 %v1255_v1  ;;  %v1416_v9 = vunpack.c.h.bf16 %v1012_v6  ;;  %v1011_v12 = vld [vmem:[%s2192_s6 + $0x28] sm:$0xff]   ;;  %v1430_v13 = vunpack.c.l.bf16 %v1012_v6  ;;  %v1010_v15 = vld [vmem:[%s2192_s6 + $0x20] sm:$0xff]   ;;  %v1262_v19 = vld [vmem:[%s2187_s1 + $0x30] sm:$0xff]  }
  0x13   :  { %v1434_v14 = vunpack.c.h.bf16 %v1011_v12  ;;  %v1442_v16 = vunpack.c.l.bf16 %v1011_v12  ;;  %v1261_v17 = vld [vmem:[%s2187_s1 + $0x28] sm:$0xff]   ;;  %v1449_v18 = vunpack.c.h.bf16 %v1010_v15  ;;  %v1009_v20 = vld [vmem:[%s2192_s6 + $0x18] sm:$0xff]   ;;  %v1459_v21 = vunpack.c.l.bf16 %v1010_v15  ;;  %v1008_v23 = vld [vmem:[%s2192_s6 + $0x10] sm:$0xff]  }
  0x14   :  { %v1464_v22 = vunpack.c.h.bf16 %v1009_v20  ;;  %v1472_v24 = vunpack.c.l.bf16 %v1009_v20  ;;  %v1263_v25 = vld [vmem:[%s2187_s1 + $0x38] sm:$0xff]   ;;  %v1479_v26 = vunpack.c.h.bf16 %v1008_v23  ;;  %v1007_v27 = vld [vmem:[%s2192_s6 + $0x8] sm:$0xff]   ;;  %v1486_v28 = vunpack.c.l.bf16 %v1008_v23  ;;  %v976_v31 = vld [vmem:[%s2192_s6] sm:$0xff]  }
  0x15   :  { %1091 = vmatpush3.bf16.msra.mxu0 %v1255_v1  ;;  %v1491_v29 = vunpack.c.h.bf16 %v1007_v27  ;;  %v1498_v30 = vunpack.c.l.bf16 %v1007_v27  ;;  %v1504_v32 = vunpack.c.h.bf16 %v976_v31  ;;  %v1508_v33 = vunpack.c.l.bf16 %v976_v31  ;;  %v352_v34 = vld [vmem:[%s2191_s5 + $0x78] sm:$0xff]  ;;  %v351_v35 = vld [vmem:[%s2191_s5 + $0x70] sm:$0xff]  ;;  %v350_v36 = vld [vmem:[%s2191_s5 + $0x68] sm:$0xff] }
  0x16   :  { %1164 = vmatprep.subr.mxu0 %v1411_v7  ;;  %1108 = vmatprep.subr.mxu1 %v352_v34  ;;  %v349_v37 = vld [vmem:[%s2191_s5 + $0x60] sm:$0xff]  ;;  %v348_v38 = vld [vmem:[%s2191_s5 + $0x58] sm:$0xff]  ;;  %v347_v46 = vld [vmem:[%s2191_s5 + $0x50] sm:$0xff] }
  0x17   :  { %1109 = vmatpush3.msra.mxu1 %v352_v34  ;;  %v346_v48 = vld [vmem:[%s2191_s5 + $0x48] sm:$0xff]  ;;  %v345_v50 = vld [vmem:[%s2191_s5 + $0x40] sm:$0xff]  ;;  %v344_v52 = vld [vmem:[%s2191_s5 + $0x38] sm:$0xff] }
  0x18   :  { %1093 = vmatmul.mubr.msk.bf16.vlgmr.msra.gmra.mxu0 %vm103_vm0, %v1257_v3  ;;  %1110 = vmatprep.subr.mxu1 %v351_v35  ;;  %v343_v55 = vld [vmem:[%s2191_s5 + $0x30] sm:$0xff]  ;;  %v342_v57 = vld [vmem:[%s2191_s5 + $0x28] sm:$0xff]  ;;  %v341_v59 = vld [vmem:[%s2191_s5 + $0x20] sm:$0xff] }
  0x19   :  { %1096 = vmatprep.mubr.msk.bf16.mxu0 %vm103_vm0, %v1258_v4  ;;  %1165 = vmatpush3.msra.mxu0 %v1411_v7  ;;  %v340_v62 = vld [vmem:[%s2191_s5 + $0x18] sm:$0xff]  ;;  %v339_v63 = vld [vmem:[%s2191_s5 + $0x10] sm:$0xff]  ;;  %v338_v0 = vld [vmem:[%s2191_s5 + $0x8] sm:$0xff] }
  0x1a   :  { %1166 = vmatprep.subr.mxu0 %v1413_v8  ;;  %1111 = vmatpush3.msra.mxu1 %v351_v35  ;;  %v337_v1 = vld [vmem:[%s2191_s5] sm:$0xff]  ;;  %s1343_s5 = smov 127  }
  0x1b   :  { %1167 = vmatpush3.msra.mxu0 %v1413_v8  ;;  %1112 = vmatprep.subr.mxu1 %v350_v36 }
  0x1c   :  { %1168 = vmatprep.subr.mxu0 %v1416_v9  ;;  %1113 = vmatpush3.msra.mxu1 %v350_v36 }
  0x1d   :  { %1169 = vmatpush3.msra.mxu0 %v1416_v9  ;;  %1114 = vmatprep.subr.mxu1 %v349_v37 }
  0x1e   :  { %1170 = vmatprep.subr.mxu0 %v1430_v13  ;;  %1115 = vmatpush3.msra.mxu1 %v349_v37 }
  0x1f   :  { %1171 = vmatpush3.msra.mxu0 %v1430_v13  ;;  %1116 = vmatprep.subr.mxu1 %v348_v38 }
  0x20   :  { %1097 = vmatmul.mubr.msk.bf16.gmra.mxu0 %vm103_vm0, %v1259_v10  ;;  %1172 = vmatprep.subr.mxu0 %v1434_v14 }
  0x21   :  { %1100 = vmatprep.mubr.msk.bf16.mxu0 %vm103_vm0, %v1260_v11  ;;  %1173 = vmatpush3.msra.mxu0 %v1434_v14 }
  0x22   :  { %1174 = vmatprep.subr.mxu0 %v1442_v16  ;;  %1117 = vmatpush3.msra.mxu1 %v348_v38 }
  0x23   :  { %1175 = vmatpush3.msra.mxu0 %v1442_v16  ;;  %1118 = vmatprep.subr.mxu1 %v347_v46 }
  0x24   :  { %1176 = vmatprep.subr.mxu0 %v1449_v18  ;;  %1119 = vmatpush3.msra.mxu1 %v347_v46 }
  0x25   :  { %1177 = vmatpush3.msra.mxu0 %v1449_v18  ;;  %1120 = vmatprep.subr.mxu1 %v346_v48 }
  0x26   :  { %1178 = vmatprep.subr.mxu0 %v1459_v21  ;;  %1121 = vmatpush3.msra.mxu1 %v346_v48 }
  0x27   :  { %1179 = vmatpush3.msra.mxu0 %v1459_v21  ;;  %1122 = vmatprep.subr.mxu1 %v345_v50 }
  0x28   :  { %1101 = vmatmul.mubr.msk.bf16.gmra.mxu0 %vm103_vm0, %v1261_v17  ;;  %1180 = vmatprep.subr.mxu0 %v1464_v22 }
  0x29   :  { %1104 = vmatprep.mubr.msk.bf16.mxu0 %vm103_vm0, %v1262_v19  ;;  %1181 = vmatpush3.msra.mxu0 %v1464_v22 }
  0x2a   :  { %1182 = vmatprep.subr.mxu0 %v1472_v24  ;;  %1123 = vmatpush3.msra.mxu1 %v345_v50 }
  0x2b   :  { %1183 = vmatpush3.msra.mxu0 %v1472_v24  ;;  %1124 = vmatprep.subr.mxu1 %v344_v52 }
  0x2c   :  { %1184 = vmatprep.subr.mxu0 %v1479_v26  ;;  %1125 = vmatpush3.msra.mxu1 %v344_v52 }
  0x2d   :  { %1185 = vmatpush3.msra.mxu0 %v1479_v26  ;;  %1126 = vmatprep.subr.mxu1 %v343_v55 }
  0x2e   :  { %1186 = vmatprep.subr.mxu0 %v1486_v28  ;;  %1127 = vmatpush3.msra.mxu1 %v343_v55 }
  0x2f   :  { %1187 = vmatpush3.msra.mxu0 %v1486_v28  ;;  %1128 = vmatprep.subr.mxu1 %v342_v57 }
  0x30   :  { %1105 = vmatmul.mubr.msk.bf16.gmra.mxu0 %vm103_vm0, %v1263_v25  ;;  %1188 = vmatprep.subr.mxu0 %v1491_v29 }
  0x31   :  { %1189 = vmatpush3.msra.mxu0 %v1491_v29  ;;  %1129 = vmatpush3.msra.mxu1 %v342_v57 }
  0x32   :  { %1190 = vmatprep.subr.mxu0 %v1498_v30  ;;  %1130 = vmatprep.subr.mxu1 %v341_v59 }
  0x33   :  { %1191 = vmatpush3.msra.mxu0 %v1498_v30  ;;  %1131 = vmatpush3.msra.mxu1 %v341_v59 }
  0x34   :  { %1192 = vmatprep.subr.mxu0 %v1504_v32  ;;  %1132 = vmatprep.subr.mxu1 %v340_v62 }
  0x35   :  { %1193 = vmatpush3.msra.mxu0 %v1504_v32  ;;  %1133 = vmatpush3.msra.mxu1 %v340_v62 }
  0x36   :  { %1194 = vmatprep.subr.mxu0 %v1508_v33  ;;  %1134 = vmatprep.subr.mxu1 %v339_v63 }
  0x37   :  { %1195 = vmatpush3.msra.mxu0 %v1508_v33  ;;  %1135 = vmatpush3.msra.mxu1 %v339_v63 }
  0x38   :  { %1136 = vmatprep.subr.mxu1 %v338_v0 }
  0x39   :  { %1137 = vmatpush3.msra.mxu1 %v338_v0 }
  0x3a   :  { %1138 = vmatprep.subr.mxu1 %v337_v1 }
  0x3b   :  { %1139 = vmatpush3.msra.mxu1 %v337_v1 }
  0x3c   :  { %1220 = vmatprep.subr.mxu1 %v1411_v7 }
  0xd8   :  { %v1528_v39 = vpop.f32.mrf.mxu0 }
  0xd9   :  { %261 = vmax.xlane.f32.xlu1 %v1528_v39 }
  0xda   :  { %v1531_v40 = vpop.f32.mrf.mxu0 }
  0xdb   :  { %257 = vmax.xlane.f32.xlu0 %v1531_v40  ;;  %1196 = vmatprep.mubr.f32.mxu0 %v1531_v40 }
  0xdc   :  { %v1535_v41 = vpop.f32.mrf.mxu0 }
  0xdd   :  { %263 = vmax.xlane.f32.xlu1 %v1535_v41 }
  0xde   :  { %v1538_v42 = vpop.f32.mrf.mxu0 }
  0xdf   :  { %259 = vmax.xlane.f32.xlu0 %v1538_v42  ;;  %1197 = vmatmul.mubr.f32.vlgmr.msra.gmra.mxu0 %v1538_v42 }
  0xe0   :  { %v1542_v43 = vpop.f32.mrf.mxu0  ;;  %1199 = vmatprep.mubr.f32.mxu0 %v1528_v39 }
  0xe2   :  { %v1545_v44 = vpop.f32.mrf.mxu0 }
  0xe3   :  { %1200 = vmatmul.mubr.f32.gmra.mxu0 %v1535_v41  ;;  %265 = vmax.xlane.f32.xlu0 %v1545_v44 }
  0xe4   :  { %v1549_v45 = vpop.f32.mrf.mxu0  ;;  %1202 = vmatprep.mubr.f32.mxu0 %v1545_v44 }
  0xe6   :  { %v1555_v47 = vpop.f32.mrf.mxu0 }
  0xe7   :  { %269 = vmax.xlane.f32.xlu0 %v1542_v43  ;;  %267 = vmax.xlane.f32.xlu1 %v1555_v47 }
  0xe8   :  { %1203 = vmatmul.mubr.f32.gmra.mxu0 %v1555_v47  ;;  %v1563_v49 = vpop.f32.mrf.mxu0 }
  0xe9   :  { %1205 = vmatprep.mubr.f32.mxu0 %v1542_v43 }
  0xea   :  { %v1569_v51 = vpop.f32.mrf.mxu0 }
  0xeb   :  { %271 = vmax.xlane.f32.xlu1 %v1549_v45  ;;  %273 = vmax.xlane.f32.xlu0 %v1569_v51 }
  0xec   :  { %1206 = vmatmul.mubr.f32.gmra.mxu0 %v1549_v45  ;;  %v1577_v53 = vpop.f32.mrf.mxu0 }
  0xed   :  { %1208 = vmatprep.mubr.f32.mxu0 %v1569_v51 }
  0xee   :  { %v1580_v54 = vpop.f32.mrf.mxu0 }
  0xef   :  { %277 = vmax.xlane.f32.xlu0 %v1563_v49  ;;  %275 = vmax.xlane.f32.xlu1 %v1580_v54 }
  0xf0   :  { %1209 = vmatmul.mubr.f32.gmra.mxu0 %v1580_v54  ;;  %v1588_v56 = vpop.f32.mrf.mxu0 }
  0xf1   :  { %1211 = vmatprep.mubr.f32.mxu0 %v1563_v49 }
  0xf2   :  { %v1594_v58 = vpop.f32.mrf.mxu0 }
  0xf3   :  { %279 = vmax.xlane.f32.xlu1 %v1577_v53  ;;  %281 = vmax.xlane.f32.xlu0 %v1594_v58 }
  0xf4   :  { %1212 = vmatmul.mubr.f32.gmra.mxu0 %v1577_v53  ;;  %v1602_v60 = vpop.f32.mrf.mxu0 }
  0xf5   :  { %1214 = vmatprep.mubr.f32.mxu0 %v1594_v58 }
  0xf6   :  { %v1605_v61 = vpop.f32.mrf.mxu0 }
  0xf7   :  { %285 = vmax.xlane.f32.xlu0 %v1588_v56  ;;  %283 = vmax.xlane.f32.xlu1 %v1605_v61 }
  0xf8   :  { %1215 = vmatmul.mubr.f32.gmra.mxu0 %v1605_v61 }
  0xfb   :  { %287 = vmax.xlane.f32.xlu1 %v1602_v60 }
 0x162   :  { %v1624_v2 = vpop.xlane.xlu1 %261 }
 0x163   :  { %v291_v5 = vsub.f32 %v1528_v39, %v1624_v2 }
 0x164   :  { %v1626_v3 = vpop.xlane.xlu0 %257 }
 0x165   :  { %v289_v4 = vsub.f32 %v1531_v40, %v1626_v3  ;;  %v309_v17 = vmul.f32 1.442695, %v291_v5 }
 0x166   :  { %v1632_v6 = vpop.xlane.xlu1 %263 }
 0x167   :  { %v305_v10 = vmul.f32 1.442695, %v289_v4  ;;  %v292_v11 = vsub.f32 %v1535_v41, %v1632_v6 }
 0x168   :  { %v1636_v12 = vpop.xlane.xlu0 %259 }
 0x169   :  { %1264 = vpow2.f32 %v305_v10  ;;  %v290_v15 = vsub.f32 %v1538_v42, %v1636_v12  ;;  %v311_v20 = vmul.f32 1.442695, %v292_v11 }
 0x16b   :  { %v307_v19 = vmul.f32 1.442695, %v290_v15 }
 0x16c   :  { %v1640_v23 = vpop.xlane.xlu0 %265 }
 0x16d   :  { %1266 = vpow2.f32 %v307_v19  ;;  %v293_v25 = vsub.f32 %v1545_v44, %v1640_v23 }
 0x16e   :  { %1268 = vpow2.f32 %v309_v17 }
 0x16f   :  { %v313_v27 = vmul.f32 1.442695, %v293_v25  ;;  %1270 = vpow2.f32 %v311_v20 }
 0x170   :  { %v1644_v31 = vpop.xlane.xlu0 %269  ;;  %v1646_v34 = vpop.xlane.xlu1 %267 }
 0x171   :  { %1272 = vpow2.f32 %v313_v27  ;;  %v295_v35 = vsub.f32 %v1542_v43, %v1644_v31  ;;  %v294_v36 = vsub.f32 %v1555_v47, %v1646_v34 }
 0x173   :  { %v317_v37 = vmul.f32 1.442695, %v295_v35  ;;  %v315_v38 = vmul.f32 1.442695, %v294_v36 }
 0x174   :  { %v1652_v39 = vpop.xlane.xlu1 %271  ;;  %v1654_v40 = vpop.xlane.xlu0 %273 }
 0x175   :  { %1274 = vpow2.f32 %v317_v37  ;;  %v296_v41 = vsub.f32 %v1549_v45, %v1652_v39  ;;  %v297_v42 = vsub.f32 %v1569_v51, %v1654_v40 }
 0x176   :  { %v1265_v44 = vpop.eup %1264  ;;  %1276 = vpow2.f32 %v315_v38 }
 0x177   :  { %v319_v46 = vmul.f32 1.442695, %v296_v41  ;;  %v321_v43 = vmul.f32 1.442695, %v297_v42  ;;  %1140 = vmatprep.mubr.f32.mxu1 %v1265_v44 }
 0x178   :  { %v1660_v48 = vpop.xlane.xlu0 %277  ;;  %v1662_v47 = vpop.xlane.xlu1 %275 }
 0x179   :  { %1278 = vpow2.f32 %v319_v46  ;;  %v299_v50 = vsub.f32 %v1563_v49, %v1660_v48  ;;  %v298_v52 = vsub.f32 %v1580_v54, %v1662_v47 }
 0x17a   :  { %v1267_v45 = vpop.eup %1266  ;;  %1280 = vpow2.f32 %v321_v43 }
 0x17b   :  { %v1269_v55 = vpop.eup %1268  ;;  %v325_v51 = vmul.f32 1.442695, %v299_v50  ;;  %v323_v57 = vmul.f32 1.442695, %v298_v52  ;;  %1141 = vmatmul.mubr.f32.vlgmr.msra.gmra.mxu1 %v1267_v45  ;;  %v1782_v50 = vld [vmem:[%s2189_s3 + $0x8] sm:$0xff]  ;;  %v1787_v52 = vld [vmem:[%s2189_s3] sm:$0xff] }
 0x17c   :  { %1236 = vmatpush3.msra.mxu1 %v1411_v7  ;;  %1143 = vmatprep.mubr.f32.mxu1 %v1269_v55  ;;  %v1669_v59 = vpop.xlane.xlu1 %279  ;;  %v1671_v62 = vpop.xlane.xlu0 %281  ;;  %v1789_v55 = vstv %s835_s18  ;;  %vm740_vm1 = vcmp.eq.f32.partialorder %v1782_v50, 0.0  ;;  %vm739_vm2 = vcmp.eq.f32.partialorder %v1787_v52, 0.0 }
 0x17d   :  { %2203 = vst [vmem:[#allocation5_spill] sm:$0xff] %v1671_v62  ;;  %v1271_v63 = vpop.eup %1270  ;;  %1282 = vpow2.f32 %v325_v51  ;;  %1221 = vmatprep.subr.mxu1 %v1413_v8  ;;  %v300_v49 = vsub.f32 %v1577_v53, %v1669_v59  ;;  %v301_v54 = vsub.f32 %v1594_v58, %v1671_v62  ;;  %v1791_v51 = vstv %s974_s19 }
 0x17e   :  { %v1273_v0 = vpop.eup %1272  ;;  %1284 = vpow2.f32 %v323_v57  ;;  %1237 = vmatpush3.msra.mxu1 %v1413_v8 }
 0x17f   :  { %v327_v7 = vmul.f32 1.442695, %v300_v49  ;;  %v329_v1 = vmul.f32 1.442695, %v301_v54  ;;  %1222 = vmatprep.subr.mxu1 %v1416_v9  ;;  %1144 = vmatmul.mubr.f32.gmra.mxu1 %v1271_v63  ;;  %v1796_v63 = vld [vmem:[%s2189_s3 + $0x18] sm:$0xff] }
 0x180   :  { %1238 = vmatpush3.msra.mxu1 %v1416_v9  ;;  %1146 = vmatprep.mubr.f32.mxu1 %v1273_v0  ;;  %v1681_v4 = vpop.xlane.xlu0 %285  ;;  %v1683_v5 = vpop.xlane.xlu1 %283  ;;  %v1804_v0 = vsel %vm740_vm1, %v1789_v55, %v1791_v51  ;;  %vm742_vm3 = vcmp.eq.f32.partialorder %v1796_v63, 0.0 }
 0x181   :  { %2204 = vst [vmem:[#allocation6_spill] sm:$0xff] %v1681_v4  ;;  %2205 = vst [vmem:[#allocation7_spill] sm:$0xff] %v1683_v5  ;;  %1286 = vpow2.f32 %v327_v7  ;;  %1223 = vmatprep.subr.mxu1 %v1430_v13  ;;  %v303_v53 = vsub.f32 %v1588_v56, %v1681_v4  ;;  %v302_v8 = vsub.f32 %v1605_v61, %v1683_v5 }
 0x182   :  { %v1275_v58 = vpop.eup %1274  ;;  %1288 = vpow2.f32 %v329_v1  ;;  %1239 = vmatpush3.msra.mxu1 %v1430_v13  ;;  %v1810_v7 = vsel %vm739_vm2, %v1789_v55, %v1791_v51 }
 0x183   :  { %v1277_v10 = vpop.eup %1276  ;;  %v333_v9 = vmul.f32 1.442695, %v303_v53  ;;  %v331_v11 = vmul.f32 1.442695, %v302_v8  ;;  %1224 = vmatprep.subr.mxu1 %v1434_v14  ;;  %v1818_v53 = vld [vmem:[%s2189_s3 + $0x10] sm:$0xff]  ;;  %v1823_v8 = vld [vmem:[%s2189_s3 + $0x20] sm:$0xff] }
 0x184   :  { %1147 = vmatmul.mubr.f32.gmra.mxu1 %v1277_v10  ;;  %v1692_v15 = vpop.xlane.xlu1 %287  ;;  %v1829_v10 = vsel %vm742_vm3, %v1789_v55, %v1791_v51  ;;  %vm741_vm4 = vcmp.eq.f32.partialorder %v1818_v53, 0.0  ;;  %vm743_vm5 = vcmp.eq.f32.partialorder %v1823_v8, 0.0 }
 0x185   :  { %2206 = vst [vmem:[#allocation8_spill] sm:$0xff] %v1692_v15  ;;  %1290 = vpow2.f32 %v333_v9  ;;  %1240 = vmatpush3.msra.mxu1 %v1434_v14  ;;  %1149 = vmatprep.mubr.f32.mxu1 %v1275_v58  ;;  %v304_v17 = vsub.f32 %v1602_v60, %v1692_v15  ;;  %v1834_v9 = vld [vmem:[%s2189_s3 + $0x28] sm:$0xff]  ;;  %v2212_v15 = vcvt.s32.f32 %v1810_v7 }
 0x186   :  { %v1279_v61 = vpop.eup %1278  ;;  %1292 = vpow2.f32 %v331_v11  ;;  %1225 = vmatprep.subr.mxu1 %v1442_v16  ;;  %vm744_vm6 = vcmp.eq.f32.partialorder %v1834_v9, 0.0 }
 0x187   :  { %v1281_v13 = vpop.eup %1280  ;;  %v335_v19 = vmul.f32 1.442695, %v304_v17  ;;  %1241 = vmatpush3.msra.mxu1 %v1442_v16  ;;  %v856_v17 = vcvt.s32.f32 %v1804_v0 }
 0x188   :  { %1226 = vmatprep.subr.mxu1 %v1449_v18  ;;  %1150 = vmatmul.mubr.f32.gmra.mxu1 %v1279_v61 }
 0x189   :  { %1294 = vpow2.f32 %v335_v19  ;;  %1242 = vmatpush3.msra.mxu1 %v1449_v18  ;;  %1152 = vmatprep.mubr.f32.mxu1 %v1281_v13  ;;  %v1841_v13 = vld [vmem:[%s2189_s3 + $0x30] sm:$0xff]  ;;  %v1846_v19 = vld [vmem:[%s2189_s3 + $0x38] sm:$0xff] }
 0x18a   :  { %v1283_v14 = vpop.eup %1282  ;;  %1227 = vmatprep.subr.mxu1 %v1459_v21  ;;  %vm745_vm7 = vcmp.eq.f32.partialorder %v1841_v13, 0.0  ;;  %vm746_vm8 = vcmp.eq.f32.partialorder %v1846_v19, 0.0 }
 0x18b   :  { %v1285_v20 = vpop.eup %1284  ;;  %1243 = vmatpush3.msra.mxu1 %v1459_v21 }
 0x18c   :  { %1228 = vmatprep.subr.mxu1 %v1464_v22  ;;  %1153 = vmatmul.mubr.f32.gmra.mxu1 %v1285_v20  ;;  %v1853_v20 = vld [vmem:[%s2189_s3 + $0x40] sm:$0xff] }
 0x18d   :  { %1244 = vmatpush3.msra.mxu1 %v1464_v22  ;;  %1155 = vmatprep.mubr.f32.mxu1 %v1283_v14  ;;  %vm747_vm9 = vcmp.eq.f32.partialorder %v1853_v20, 0.0 }
 0x18e   :  { %v1287_v16 = vpop.eup %1286  ;;  %1229 = vmatprep.subr.mxu1 %v1472_v24  ;;  %v1901_v0 = vsel %vm747_vm9, %v1789_v55, %v1791_v51 }
 0x18f   :  { %v1289_v25 = vpop.eup %1288  ;;  %1245 = vmatpush3.msra.mxu1 %v1472_v24 }
 0x190   :  { %1230 = vmatprep.subr.mxu1 %v1479_v26  ;;  %1156 = vmatmul.mubr.f32.gmra.mxu1 %v1287_v16 }
 0x191   :  { %1246 = vmatpush3.msra.mxu1 %v1479_v26  ;;  %1158 = vmatprep.mubr.f32.mxu1 %v1289_v25 }
 0x192   :  { %v1291_v18 = vpop.eup %1290  ;;  %1231 = vmatprep.subr.mxu1 %v1486_v28 }
 0x193   :  { %v1293_v21 = vpop.eup %1292  ;;  %1247 = vmatpush3.msra.mxu1 %v1486_v28 }
 0x194   :  { %1232 = vmatprep.subr.mxu1 %v1491_v29  ;;  %1159 = vmatmul.mubr.f32.gmra.mxu1 %v1293_v21  ;;  %v1866_v21 = vsel %vm743_vm5, %v1789_v55, %v1791_v51 }
 0x195   :  { %1248 = vmatpush3.msra.mxu1 %v1491_v29  ;;  %1161 = vmatprep.mubr.f32.mxu1 %v1291_v18  ;;  %v1860_v18 = vsel %vm741_vm4, %v1789_v55, %v1791_v51  ;;  %v2215_v9 = vcvt.s32.f32 %v1866_v21 }
 0x196   :  { %v1295_v22 = vpop.eup %1294  ;;  %1233 = vmatprep.subr.mxu1 %v1498_v30 }
 0x197   :  { %1249 = vmatpush3.msra.mxu1 %v1498_v30 }
 0x198   :  { %1234 = vmatprep.subr.mxu1 %v1504_v32  ;;  %1162 = vmatmul.mubr.f32.gmra.mxu1 %v1295_v22  ;;  %v1872_v22 = vld [vmem:[%s2189_s3 + $0x48] sm:$0xff] }
 0x199   :  { %1250 = vmatpush3.msra.mxu1 %v1504_v32  ;;  %1217 = vmatprep.mubr.f32.mxu1 %v1588_v56  ;;  %vm748_vm10 = vcmp.eq.f32.partialorder %v1872_v22, 0.0 }
 0x19a   :  { %1235 = vmatprep.subr.mxu1 %v1508_v33 }
 0x19b   :  { %1251 = vmatpush3.msra.mxu1 %v1508_v33 }
 0x19c   :  { %1218 = vmatmul.mubr.f32.vlgmr.msra.gmra.mxu1 %v1602_v60 }
 0x19f   :  { %v1721_v24 = vpop.f32.mrf.mxu0 }
 0x1a0   :  { %773 = vrot.lane.b32.xlu1 %v1721_v24, %s1343_s5 }
 0x1a1   :  { %v1725_v26 = vpop.f32.mrf.mxu0 }
 0x1a2   :  { %771 = vrot.lane.b32.xlu0 %v1725_v26, %s1343_s5 }
 0x1a3   :  { %v1729_v28 = vpop.f32.mrf.mxu0 }
 0x1a4   :  { %777 = vrot.lane.b32.xlu1 %v1729_v28, %s1343_s5 }
 0x1a5   :  { %v1733_v29 = vpop.f32.mrf.mxu0 }
 0x1a8   :  { %v1735_v30 = vpop.f32.mrf.mxu0  ;;  %775 = vrot.lane.b32.xlu1 %v1733_v29, %s1343_s5 }
 0x1aa   :  { %v1739_v32 = vpop.f32.mrf.mxu0 }
 0x1ab   :  { %779 = vrot.lane.b32.xlu0 %v1739_v32, %s1343_s5 }
 0x1ac   :  { %v1743_v33 = vpop.f32.mrf.mxu0  ;;  %781 = vrot.lane.b32.xlu1 %v1735_v30, %s1343_s5 }
 0x1ae   :  { %v1747_v56 = vpop.f32.mrf.mxu0 }
 0x1af   :  { %783 = vrot.lane.b32.xlu0 %v1747_v56, %s1343_s5 }
 0x1b0   :  { %v1751_v60 = vpop.f32.mrf.mxu0  ;;  %785 = vrot.lane.b32.xlu1 %v1743_v33, %s1343_s5 }
 0x1b2   :  { %v1755_v27 = vpop.f32.mrf.mxu0 }
 0x1b3   :  { %787 = vrot.lane.b32.xlu0 %v1755_v27, %s1343_s5 }
 0x1b4   :  { %v1759_v35 = vpop.f32.mrf.mxu0  ;;  %789 = vrot.lane.b32.xlu1 %v1751_v60, %s1343_s5 }
 0x1b5   :  { %2207 = vst [vmem:[#allocation9_spill] sm:$0xff] %v1759_v35 }
 0x1b6   :  { %v1763_v36 = vpop.f32.mrf.mxu0 }
 0x1b7   :  { %2208 = vst [vmem:[#allocation10_spill] sm:$0xff] %v1763_v36  ;;  %791 = vrot.lane.b32.xlu0 %v1763_v36, %s1343_s5 }
 0x1b8   :  { %v1767_v37 = vpop.f32.mrf.mxu0  ;;  %793 = vrot.lane.b32.xlu1 %v1759_v35, %s1343_s5 }
 0x1b9   :  { %2209 = vst [vmem:[#allocation11_spill] sm:$0xff] %v1767_v37 }
 0x1ba   :  { %v1771_v38 = vpop.f32.mrf.mxu0 }
 0x1bb   :  { %2210 = vst [vmem:[#allocation12_spill] sm:$0xff] %v1771_v38  ;;  %795 = vrot.lane.b32.xlu0 %v1771_v38, %s1343_s5 }
 0x1bc   :  { %797 = vrot.lane.b32.xlu1 %v1767_v37, %s1343_s5 }
 0x212   :  { %v1777_v44 = vpop.permute.xlu1 %773 }
 0x216   :  { %v1812_v1 = vpop.permute.xlu1 %777 }
 0x23b   :  { %v1142_v41 = vpop.f32.mrf.mxu1 }
 0x23c   :  { %v499_v42 = vmax.f32 %v1142_v41, 1e-30 }
 0x23d   :  { %v419_v46 = vpop.f32.mrf.mxu1 }
 0x23e   :  { %1296 = vlog2.f32 %v499_v42  ;;  %v498_v43 = vmax.f32 %v419_v46, 1e-30  ;;  %v1874_v42 = vpop.permute.xlu1 %775 }
 0x23f   :  { %v1145_v45 = vpop.f32.mrf.mxu1 }
 0x240   :  { %1298 = vlog2.f32 %v498_v43  ;;  %v501_v57 = vmax.f32 %v1145_v45, 1e-30  ;;  %v1882_v43 = vsel %vm744_vm6, %v1789_v55, %v1791_v51  ;;  %v1888_v45 = vsel %vm745_vm7, %v1789_v55, %v1791_v51 }
 0x241   :  { %v429_v49 = vpop.f32.mrf.mxu1 }
 0x242   :  { %1300 = vlog2.f32 %v501_v57  ;;  %v500_v54 = vmax.f32 %v429_v49, 1e-30  ;;  %v1894_v57 = vsel %vm746_vm8, %v1789_v55, %v1791_v51  ;;  %v1922_v35 = vpop.permute.xlu1 %781 }
 0x244   :  { %1302 = vlog2.f32 %v500_v54  ;;  %v1148_v58 = vpop.f32.mrf.mxu1 }
 0x245   :  { %v503_v11 = vmax.f32 %v1148_v58, 1e-30 }
 0x246   :  { %v439_v14 = vpop.f32.mrf.mxu1  ;;  %v786_v63 = vpop.permute.xlu1 %785 }
 0x247   :  { %1304 = vlog2.f32 %v503_v11  ;;  %v502_v16 = vmax.f32 %v439_v14, 1e-30  ;;  %v857_v11 = vcvt.s32.f32 %v1860_v18 }
 0x248   :  { %v1151_v41 = vpop.f32.mrf.mxu1 }
 0x249   :  { %1306 = vlog2.f32 %v502_v16  ;;  %v505_v46 = vmax.f32 %v1151_v41, 1e-30  ;;  %v1910_v16 = vsel %vm748_vm10, %v1789_v55, %v1791_v51  ;;  %v1915_v41 = vld [vmem:[%s2189_s3 + $0x50] sm:$0xff] }
 0x24a   :  { %v449_v49 = vpop.f32.mrf.mxu1  ;;  %2211 = vst [vmem:[#allocation13_spill] sm:$0xff] %v1915_v41  ;;  %vm749_vm11 = vcmp.eq.f32.partialorder %v1915_v41, 0.0 }
 0x24b   :  { %v1297_v54 = vpop.eup %1296  ;;  %1308 = vlog2.f32 %v505_v46  ;;  %v504_v58 = vmax.f32 %v449_v49, 1e-30  ;;  %v772_v46 = vpop.permute.xlu0 %771 }
 0x24c   :  { %v517_v25 = vmul.f32 0.6931472, %v1297_v54  ;;  %v1154_v61 = vpop.f32.mrf.mxu1  ;;  %v820_v54 = vsel %vm740_vm1, %v1721_v24, %v1777_v44  ;;  %v822_v24 = vsel %vm742_vm3, %v1729_v28, %v1812_v1  ;;  %v242_v44 = vld [vmem:[%s2190_s4 + $0x8] sm:$0xff]  ;;  %v821_v28 = vsel %vm741_vm4, %v1733_v29, %v1874_v42  ;;  %v1962_v1 = vld [vmem:[%s2189_s3 + $0x58] sm:$0xff] }
 0x24d   :  { %v1299_v4 = vpop.eup %1298  ;;  %1310 = vlog2.f32 %v504_v58  ;;  %v507_v14 = vmax.f32 %v1154_v61, 1e-30  ;;  %v1930_v61 = vsel %vm749_vm11, %v1789_v55, %v1791_v51  ;;  %v244_v42 = vld [vmem:[%s2190_s4 + $0x18] sm:$0xff]  ;;  %vm750_vm13 = vcmp.eq.f32.partialorder %v1962_v1, 0.0 }
 0x24e   :  { %v547_v37 = vadd.f32 %v517_v25, %v1636_v12  ;;  %v515_v62 = vmul.f32 0.6931472, %v1299_v4  ;;  %v459_v36 = vpop.f32.mrf.mxu1 }
 0x24f   :  { %v1301_v5 = vpop.eup %1300  ;;  %1312 = vlog2.f32 %v507_v14  ;;  %v506_v49 = vmax.f32 %v459_v36, 1e-30  ;;  %v1937_v18 = vpop.permute.xlu0 %779 }
 0x250   :  { %v872_v58 = vmul.f32 %v856_v17, %v547_v37  ;;  %v546_v12 = vadd.f32 %v515_v62, %v1626_v3  ;;  %v521_v4 = vmul.f32 0.6931472, %v1301_v5  ;;  %v1157_v25 = vpop.f32.mrf.mxu1  ;;  %v819_v5 = vsel %vm739_vm2, %v1725_v26, %v772_v46 }
 0x251   :  { %v1303_v38 = vpop.eup %1302  ;;  %1314 = vlog2.f32 %v506_v49  ;;  %v509_v36 = vmax.f32 %v1157_v25, 1e-30 }
 0x252   :  { %v888_v14 = vsub.f32 %v872_v58, %v820_v54  ;;  %v871_v41 = vmul.f32 %v2212_v15, %v546_v12  ;;  %v549_v37 = vadd.f32 %v521_v4, %v1632_v6  ;;  %v519_v3 = vmul.f32 0.6931472, %v1303_v38  ;;  %v469_v62 = vpop.f32.mrf.mxu1 }
 0x253   :  { %1316 = vlog2.f32 %v509_v36  ;;  %v508_v50 = vmax.f32 %v469_v62, 1e-30  ;;  %v2213_v38 = vcvt.s32.f32 %v1829_v10  ;;  %v784_v29 = vpop.permute.xlu0 %783 }
 0x254   :  { %v1305_v15 = vpop.eup %1304  ;;  %v904_v7 = vmul.f32 0.03125, %v888_v14  ;;  %v887_v6 = vsub.f32 %v871_v41, %v819_v5  ;;  %v548_v52 = vadd.f32 %v519_v3, %v1624_v2  ;;  %v1160_v26 = vpop.f32.mrf.mxu1  ;;  %v241_v41 = vld [vmem:[%s2190_s4] sm:$0xff]  ;;  %v243_v5 = vld [vmem:[%s2190_s4 + $0x10] sm:$0xff] }
 0x255   :  { %v874_v17 = vmul.f32 %v2213_v38, %v549_v37  ;;  %v525_v10 = vmul.f32 0.6931472, %v1305_v15  ;;  %1318 = vlog2.f32 %v508_v50  ;;  %v511_v46 = vmax.f32 %v1160_v26, 1e-30 }
 0x256   :  { %v1307_v2 = vpop.eup %1306  ;;  %v920_v49 = vmul.f32 %v904_v7, %v242_v44  ;;  %v903_v54 = vmul.f32 0.03125, %v887_v6  ;;  %v873_v12 = vmul.f32 %v857_v11, %v548_v52  ;;  %v479_v53 = vpop.f32.mrf.mxu1  ;;  %v824_v6 = vsel %vm744_vm6, %v1735_v30, %v1922_v35  ;;  %v2008_v30 = vld [vmem:[%s2189_s3 + $0x68] sm:$0xff] }
 0x257   :  { %v890_v58 = vsub.f32 %v874_v17, %v822_v24  ;;  %v551_v4 = vadd.f32 %v525_v10, %v1646_v34  ;;  %v523_v25 = vmul.f32 0.6931472, %v1307_v2  ;;  %1320 = vlog2.f32 %v511_v46  ;;  %v1981_v34 = vld [vmem:[%s2189_s3 + $0x60] sm:$0xff]  ;;  %v790_v52 = vpop.permute.xlu1 %789 }
 0x258   :  { %v510_v36 = vmax.f32 %v479_v53, 1e-30  ;;  %v1309_v14 = vpop.eup %1308  ;;  %937 = vst.msk [vmem:[%s2193_s7 + $0x8] sm:$0xff] %vm935_vm12, %v920_v49  ;;  %v919_v11 = vmul.f32 %v903_v54, %v241_v41  ;;  %v889_v3 = vsub.f32 %v873_v12, %v821_v28  ;;  %v1976_v62 = vpop.f32.mrf.mxu1  ;;  %v2214_v24 = vcvt.s32.f32 %v1882_v43 }
 0x259   :  { %v906_v37 = vmul.f32 0.03125, %v890_v58  ;;  %v550_v50 = vadd.f32 %v523_v25, %v1640_v23  ;;  %v529_v15 = vmul.f32 0.6931472, %v1309_v14  ;;  %v1997_v38 = vsel %vm750_vm13, %v1789_v55, %v1791_v51  ;;  %v788_v54 = vpop.permute.xlu0 %787 }
 0x25a   :  { %v876_v44 = vmul.f32 %v2214_v24, %v551_v4  ;;  %1322 = vlog2.f32 %v510_v36  ;;  %v1311_v7 = vpop.eup %1310  ;;  %936 = vst.msk [vmem:[%s2193_s7] sm:$0xff] %vm935_vm12, %v919_v11  ;;  %v905_v43 = vmul.f32 0.03125, %v889_v3  ;;  %v2003_v17 = vpop.f32.mrf.mxu1  ;;  %v823_v46 = vsel %vm743_vm5, %v1739_v32, %v1937_v18 }
 0x25b   :  { %v922_v23 = vmul.f32 %v906_v37, %v244_v42  ;;  %v875_v26 = vmul.f32 %v2215_v9, %v550_v50  ;;  %v553_v28 = vadd.f32 %v529_v15, %v1652_v39  ;;  %v527_v41 = vmul.f32 0.6931472, %v1311_v7  ;;  %v246_v39 = vld [vmem:[%s2190_s4 + $0x28] sm:$0xff] }
 0x25c   :  { %v892_v35 = vsub.f32 %v876_v44, %v824_v6  ;;  %v1313_v10 = vpop.eup %1312  ;;  %v865_v2 = vcvt.s32.f32 %v1930_v61  ;;  %vm751_vm14 = vcmp.eq.f32.partialorder %v1981_v34, 0.0  ;;  %v921_v21 = vmul.f32 %v905_v43, %v243_v5  ;;  %v2026_v49 = vpop.f32.mrf.mxu1  ;;  %v248_v5 = vld [vmem:[%s2190_s4 + $0x38] sm:$0xff]  ;;  %v247_v6 = vld [vmem:[%s2190_s4 + $0x30] sm:$0xff]  ;;  %v253_v34 = vld [vmem:[%s2190_s4 + $0x60] sm:$0xff] }
 0x25d   :  { %939 = vst.msk [vmem:[%s2193_s7 + $0x18] sm:$0xff] %vm935_vm12, %v922_v23  ;;  %v891_v8 = vsub.f32 %v875_v26, %v823_v46  ;;  %v2216_v32 = vcvt.s32.f32 %v1894_v57  ;;  %v552_v12 = vadd.f32 %v527_v41, %v1644_v31  ;;  %801 = vrot.lane.b32.xlu1 %v2026_v49, %s1343_s5  ;;  %v826_v42 = vsel %vm746_vm8, %v1743_v33, %v786_v63  ;;  %v245_v31 = vld [vmem:[%s2190_s4 + $0x20] sm:$0xff]  ;;  %v794_v44 = vpop.permute.xlu1 %793 }
 0x25e   :  { %v908_v58 = vmul.f32 0.03125, %v892_v35  ;;  %v1315_v53 = vpop.eup %1314  ;;  %v866_v4 = vcvt.s32.f32 %v1997_v38  ;;  %vm752_vm15 = vcmp.eq.f32.partialorder %v2008_v30, 0.0  ;;  %938 = vst.msk [vmem:[%s2193_s7 + $0x10] sm:$0xff] %vm935_vm12, %v921_v21  ;;  %v533_v57 = vmul.f32 0.6931472, %v1313_v10  ;;  %v2045_v25 = vpop.f32.mrf.mxu1  ;;  %v254_v30 = vld [vmem:[%s2190_s4 + $0x68] sm:$0xff] }
 0x25f   :  { %v878_v18 = vmul.f32 %v2216_v32, %v553_v28  ;;  %v907_v14 = vmul.f32 0.03125, %v891_v8  ;;  %v2217_v33 = vcvt.s32.f32 %v1888_v45  ;;  %799 = vrot.lane.b32.xlu0 %v2045_v25, %s1343_s5  ;;  %v825_v37 = vsel %vm745_vm7, %v1747_v56, %v784_v29  ;;  %v792_v35 = vpop.permute.xlu0 %791 }
 0x260   :  { %v924_v36 = vmul.f32 %v908_v58, %v246_v39  ;;  %v1317_v11 = vpop.eup %1316  ;;  %v852_v3 = vsel %vm752_vm15, %v1789_v55, %v1791_v51  ;;  %v555_v45 = vadd.f32 %v533_v57, %v1662_v47  ;;  %v531_v24 = vmul.f32 0.6931472, %v1315_v53 }
 0x261   :  { %v894_v19 = vsub.f32 %v878_v18, %v826_v42  ;;  %v877_v63 = vmul.f32 %v2217_v33, %v552_v12  ;;  %v923_v13 = vmul.f32 %v907_v14, %v245_v31  ;;  %v537_v50 = vmul.f32 0.6931472, %v1317_v11  ;;  %v798_v18 = vpop.permute.xlu1 %797  ;;  %v249_v12 = vld [vmem:[%s2190_s4 + $0x40] sm:$0xff]  ;;  %v2221_v42 = vld [vmem:[#allocation7_spill] sm:$0xff]  ;;  %v2222_v31 = vld [vmem:[#allocation10_spill] sm:$0xff] }
 0x262   :  { %941 = vst.msk [vmem:[%s2193_s7 + $0x28] sm:$0xff] %vm935_vm12, %v924_v36  ;;  %v1319_v15 = vpop.eup %1318  ;;  %v828_v7 = vsel %vm748_vm10, %v1751_v60, %v790_v52  ;;  %v851_v47 = vsel %vm751_vm14, %v1789_v55, %v1791_v51  ;;  %v2218_v38 = vcvt.s32.f32 %v1910_v16  ;;  %v554_v43 = vadd.f32 %v531_v24, %v1654_v40  ;;  %v252_v33 = vld [vmem:[%s2190_s4 + $0x58] sm:$0xff] }
 0x263   :  { %v910_v56 = vmul.f32 0.03125, %v894_v19  ;;  %v893_v29 = vsub.f32 %v877_v63, %v825_v37  ;;  %940 = vst.msk [vmem:[%s2193_s7 + $0x20] sm:$0xff] %vm935_vm12, %v923_v13  ;;  %v557_v52 = vadd.f32 %v537_v50, %v1669_v59  ;;  %v535_v9 = vmul.f32 0.6931472, %v1319_v15  ;;  %v250_v59 = vld [vmem:[%s2190_s4 + $0x48] sm:$0xff]  ;;  %v796_v63 = vpop.permute.xlu0 %795  ;;  %v2226_v15 = vld [vmem:[#allocation12_spill] sm:$0xff] }
 0x264   :  { %v880_v23 = vmul.f32 %v2218_v38, %v555_v45  ;;  %v1321_v26 = vpop.eup %1320  ;;  %v827_v28 = vsel %vm747_vm9, %v1755_v27, %v788_v54  ;;  %v868_v16 = vcvt.s32.f32 %v852_v3  ;;  %v2219_v40 = vcvt.s32.f32 %v1901_v0  ;;  %v2220_v54 = vld [vmem:[#allocation9_spill] sm:$0xff] }
 0x265   :  { %v926_v60 = vmul.f32 %v910_v56, %v248_v5  ;;  %v909_v22 = vmul.f32 0.03125, %v893_v29  ;;  %v882_v21 = vmul.f32 %v866_v4, %v557_v52  ;;  %v556_v39 = vadd.f32 %v535_v9, %v1660_v48  ;;  %v2224_v5 = vld [vmem:[#allocation5_spill] sm:$0xff]  ;;  %v240_v52 = vld [vmem:[%s2189_s3 + $0x78] sm:$0xff] }
 0x266   :  { %v896_v41 = vsub.f32 %v880_v23, %v828_v7  ;;  %v879_v10 = vmul.f32 %v2219_v40, %v554_v43  ;;  %v541_v20 = vmul.f32 0.6931472, %v1321_v26  ;;  %v830_v0 = vsel %vm750_vm13, %v2220_v54, %v794_v44  ;;  %v251_v44 = vld [vmem:[%s2190_s4 + $0x50] sm:$0xff]  ;;  %v2227_v40 = vld [vmem:[#allocation8_spill] sm:$0xff] }
 0x267   :  { %943 = vst.msk [vmem:[%s2193_s7 + $0x38] sm:$0xff] %vm935_vm12, %v926_v60  ;;  %v925_v46 = vmul.f32 %v909_v22, %v247_v6  ;;  %v1323_v27 = vpop.eup %1322  ;;  %v867_v58 = vcvt.s32.f32 %v851_v47  ;;  %v898_v48 = vsub.f32 %v882_v21, %v830_v0  ;;  %v881_v53 = vmul.f32 %v865_v2, %v556_v39  ;;  %v2225_v2 = vld [vmem:[#allocation11_spill] sm:$0xff] }
 0x268   :  { %v912_v8 = vmul.f32 0.03125, %v896_v41  ;;  %v895_v32 = vsub.f32 %v879_v10, %v827_v28  ;;  %v559_v1 = vadd.f32 %v541_v20, %v2221_v42  ;;  %v539_v4 = vmul.f32 0.6931472, %v1323_v27  ;;  %v239_v26 = vld [vmem:[%s2189_s3 + $0x70] sm:$0xff] }
 0x269   :  { %942 = vst.msk [vmem:[%s2193_s7 + $0x30] sm:$0xff] %vm935_vm12, %v925_v46  ;;  %v829_v36 = vsel %vm749_vm11, %v2222_v31, %v792_v35  ;;  %v914_v11 = vmul.f32 0.03125, %v898_v48  ;;  %v832_v45 = vsel %vm752_vm15, %v2225_v2, %v798_v18  ;;  %v831_v7 = vsel %vm751_vm14, %v2226_v15, %v796_v63 }
 0x26a   :  { %v928_v14 = vmul.f32 %v912_v8, %v250_v59  ;;  %v911_v19 = vmul.f32 0.03125, %v895_v32  ;;  %v897_v37 = vsub.f32 %v881_v53, %v829_v36  ;;  %v884_v3 = vmul.f32 %v868_v16, %v559_v1  ;;  %v2228_v59 = vld [vmem:[#allocation6_spill] sm:$0xff]  ;;  %v256_v32 = vld [vmem:[%s2190_s4 + $0x78] sm:$0xff] }
 0x26b   :  { %v558_v61 = vadd.f32 %v539_v4, %v2224_v5  ;;  %v930_v13 = vmul.f32 %v914_v11, %v252_v33  ;;  %v513_v60 = vmax.f32 %v1976_v62, 1e-30  ;;  %v512_v22 = vmax.f32 %v2003_v17, 1e-30 }
 0x26c   :  { %945 = vst.msk [vmem:[%s2193_s7 + $0x48] sm:$0xff] %vm935_vm12, %v928_v14  ;;  %v927_v24 = vmul.f32 %v911_v19, %v249_v12  ;;  %v913_v56 = vmul.f32 0.03125, %v897_v37  ;;  %v900_v29 = vsub.f32 %v884_v3, %v832_v45  ;;  %vm754_vm0 = vcmp.eq.f32.partialorder %v240_v52, 0.0  ;;  %v255_v12 = vld [vmem:[%s2190_s4 + $0x70] sm:$0xff] }
 0x26d   :  { %v883_v50 = vmul.f32 %v867_v58, %v558_v61  ;;  %947 = vst.msk [vmem:[%s2193_s7 + $0x58] sm:$0xff] %vm935_vm12, %v930_v13  ;;  %1324 = vlog2.f32 %v513_v60  ;;  %vm753_vm1 = vcmp.eq.f32.partialorder %v239_v26, 0.0  ;;  %v854_v62 = vsel %vm754_vm0, %v1789_v55, %v1791_v51 }
 0x26e   :  { %944 = vst.msk [vmem:[%s2193_s7 + $0x40] sm:$0xff] %vm935_vm12, %v927_v24  ;;  %v929_v47 = vmul.f32 %v913_v56, %v251_v44  ;;  %v916_v6 = vmul.f32 0.03125, %v900_v29  ;;  %1326 = vlog2.f32 %v512_v22  ;;  %v853_v17 = vsel %vm753_vm1, %v1789_v55, %v1791_v51 }
 0x26f   :  { %v899_v38 = vsub.f32 %v883_v50, %v831_v7  ;;  %v870_v46 = vcvt.s32.f32 %v854_v62  ;;  %v869_v39 = vcvt.s32.f32 %v853_v17 }
 0x270   :  { %946 = vst.msk [vmem:[%s2193_s7 + $0x50] sm:$0xff] %vm935_vm12, %v929_v47  ;;  %v932_v23 = vmul.f32 %v916_v6, %v254_v30 }
 0x271   :  { %v915_v43 = vmul.f32 0.03125, %v899_v38 }
 0x272   :  { %949 = vst.msk [vmem:[%s2193_s7 + $0x68] sm:$0xff] %vm935_vm12, %v932_v23 }
 0x273   :  { %v931_v35 = vmul.f32 %v915_v43, %v253_v34 }
 0x275   :  { %948 = vst.msk [vmem:[%s2193_s7 + $0x60] sm:$0xff] %vm935_vm12, %v931_v35 }
 0x27a   :  { %v1325_v9 = vpop.eup %1324 }
 0x27b   :  { %v1327_v28 = vpop.eup %1326  ;;  %v545_v16 = vmul.f32 0.6931472, %v1325_v9 }
 0x27c   :  { %v543_v41 = vmul.f32 0.6931472, %v1327_v28 }
 0x27d   :  { %v561_v10 = vadd.f32 %v545_v16, %v2227_v40 }
 0x27e   :  { %v560_v21 = vadd.f32 %v543_v41, %v2228_v59 }
 0x27f   :  { %v886_v20 = vmul.f32 %v870_v46, %v561_v10 }
 0x280   :  { %v885_v58 = vmul.f32 %v869_v39, %v560_v21 }
 0x2cf   :  { %v802_v27 = vpop.permute.xlu1 %801 }
 0x2d0   :  { %v834_v54 = vsel %vm754_vm0, %v2026_v49, %v802_v27 }
 0x2d1   :  { %v902_v0 = vsub.f32 %v886_v20, %v834_v54  ;;  %v800_v8 = vpop.permute.xlu0 %799 }
 0x2d2   :  { %v833_v18 = vsel %vm753_vm1, %v2045_v25, %v800_v8 }
 0x2d3   :  { %v918_v55 = vmul.f32 0.03125, %v902_v0  ;;  %v901_v51 = vsub.f32 %v885_v58, %v833_v18 }
 0x2d5   :  { %v934_v48 = vmul.f32 %v918_v55, %v256_v32  ;;  %v917_v53 = vmul.f32 0.03125, %v901_v51 }
 0x2d7   :  { %951 = vst.msk [vmem:[%s2193_s7 + $0x78] sm:$0xff] %vm935_vm12, %v934_v48  ;;  %v933_v49 = vmul.f32 %v917_v53, %v255_v12 }
 0x2d9   :  { %950 = vst.msk [vmem:[%s2193_s7 + $0x70] sm:$0xff] %vm935_vm12, %v933_v49 }

</bundles_post_ra>
